<compile_context>
chip_gen: v6e
topology: v6e:2x2x1
jax: 0.10.0
libtpu: 0.0.40
codegen_flags: <defaults>
</compile_context>

<pallas_src>
import functools
import jax
import jax.numpy as jnp
from jax.experimental import pallas as pl
from jax.experimental.pallas import tpu as pltpu


# ---------------------------------------------------------------------------
# Fused Pallas kernel (built per static config: num_layers, T, batch tile, H)
# ---------------------------------------------------------------------------
def _make_fused_kernel(num_layers, seq_len, batch_tile, hidden):
    T, BT, H = seq_len, batch_tile, hidden

    def kernel(*refs):
        # refs = [x] + [wih_t, whh_t, b] * num_layers + [w1_t, b1, w2_t, b2] + [out]
        x_ref = refs[0]                                   # (BT, T, F)
        lstm_refs = refs[1:1 + 3 * num_layers]
        w1_ref, b1_ref, w2_ref, b2_ref = refs[1 + 3 * num_layers:5 + 3 * num_layers]
        out_ref = refs[5 + 3 * num_layers]                # (BT, O_pad)

        x_all = x_ref[...]                                # (BT, T, F)

        wih = [lstm_refs[3 * l][...] for l in range(num_layers)]      # (F_in, 4H)
        whh = [lstm_refs[3 * l + 1][...] for l in range(num_layers)]  # (H, 4H)
        bias = [lstm_refs[3 * l + 2][...] for l in range(num_layers)]  # (1, 4H)

        # Layer-0 input projections for every timestep: independent of the
        # recurrence, hoisted ahead of the wavefront loop (off the critical path).
        proj0 = [
            jnp.dot(x_all[:, t, :], wih[0], preferred_element_type=jnp.float32)
            + bias[0]
            for t in range(T)
        ]

        h = [jnp.zeros((BT, H), jnp.float32) for _ in range(num_layers)]
        c = [jnp.zeros((BT, H), jnp.float32) for _ in range(num_layers)]

        def cell(gates, c_prev):
            # Full-vreg transcendentals over the 4H (=128-lane) gate block; gate
            # sub-blocks are sliced afterwards (EUP slot has slack here).
            sg = jax.nn.sigmoid(gates)
            th = jnp.tanh(gates)
            i_g = sg[:, 0 * H:1 * H]
            f_g = sg[:, 1 * H:2 * H]
            g_g = th[:, 2 * H:3 * H]
            o_g = sg[:, 3 * H:4 * H]
            c_new = f_g * c_prev + i_g * g_g
            h_new = o_g * jnp.tanh(c_new)
            return h_new, c_new

        # Wavefront schedule: at wave s, layer l computes time t = s - l.
        # h[l-1] (not yet updated this wave) holds exactly time t, so all active
        # steps in a wave are independent -> overlapping MXU/EUP latency chains.
        for s in range(T + num_layers - 1):
            updates = {}
            for l in range(num_layers):
                t = s - l
                if not (0 <= t < T):
                    continue
                if l == 0:
                    gates = proj0[t] + jnp.dot(
                        h[0], whh[0], preferred_element_type=jnp.float32
                    )
                else:
                    # Separate dots (input & hidden) so v5e's independent MXUs
                    # can take them concurrently; they pipeline on v6e/v7x.
                    gates = (
                        jnp.dot(h[l - 1], wih[l], preferred_element_type=jnp.float32)
                        + jnp.dot(h[l], whh[l], preferred_element_type=jnp.float32)
                        + bias[l]
                    )
                updates[l] = cell(gates, c[l])
            for l, (h_new, c_new) in updates.items():
                h[l], c[l] = h_new, c_new
            # TODO(synk): inter-layer LSTM dropout omitted (identity in eval mode).

        # Head on the last timestep of the top layer; dropout = identity (eval).
        # All head operands are lane-padded to 128 -> lane-dense stores.
        z = jnp.dot(h[num_layers - 1], w1_ref[...], preferred_element_type=jnp.float32)
        z = jnp.maximum(z + b1_ref[...], 0.0)
        out_ref[...] = (
            jnp.dot(z, w2_ref[...], preferred_element_type=jnp.float32) + b2_ref[...]
        )

    return kernel


# ---------------------------------------------------------------------------
# Wrapper
# ---------------------------------------------------------------------------
@functools.partial(
    jax.jit, static_argnames=("num_layers", "hidden_size", "output_size")
)
def lstm_forecaster_forward(x, params, num_layers, hidden_size, output_size):
    """x: (B, T, input_size), batch-first like the PyTorch module."""
    B, T, F = x.shape
    H = hidden_size
    O_pad = params["w2_t"].shape[1]           # head already lane-padded to 128
    x = x.astype(jnp.float32)

    # Batch-tile grid axis (size 1 today).  Marked "parallel" so larger batches
    # shard across the two v7x TensorCores; no padding at tiny batch.
    BT = B if B < 8 else 8
    pad = (-B) % BT
    if pad:
        x = jnp.pad(x, ((0, pad), (0, 0), (0, 0)))
    nb = (B + pad) // BT

    args = [x]
    for layer in range(num_layers):
        p = params["lstm"][layer]
        args += [p["wih_t"], p["whh_t"], p["b"]]
    args += [params["w1_t"], params["b1"], params["w2_t"], params["b2"]]

    def _zeros2(b):
        return (0, 0)

    in_specs = [pl.BlockSpec((BT, T, F), lambda b: (b, 0, 0))]
    for layer in range(num_layers):
        p = params["lstm"][layer]
        in_specs += [
            pl.BlockSpec(p["wih_t"].shape, _zeros2),
            pl.BlockSpec(p["whh_t"].shape, _zeros2),
            pl.BlockSpec(p["b"].shape, _zeros2),
        ]
    in_specs += [
        pl.BlockSpec(params["w1_t"].shape, _zeros2),
        pl.BlockSpec(params["b1"].shape, _zeros2),
        pl.BlockSpec(params["w2_t"].shape, _zeros2),
        pl.BlockSpec(params["b2"].shape, _zeros2),
    ]
    out_specs = pl.BlockSpec((BT, O_pad), lambda b: (b, 0))

    out = pl.pallas_call(
        _make_fused_kernel(num_layers, T, BT, H),
        out_shape=jax.ShapeDtypeStruct((B + pad, O_pad), jnp.float32),
        grid_spec=pltpu.PrefetchScalarGridSpec(
            num_scalar_prefetch=0,
            grid=(nb,),
            in_specs=in_specs,
            out_specs=out_specs,
        ),
        compiler_params=pltpu.CompilerParams(dimension_semantics=("parallel",)),
    )(*args)
    return out[:B, :output_size]


# ---------------------------------------------------------------------------
# Deterministic parameter init (shapes follow nn.LSTM / nn.Linear);
# head weights are zero-padded to 128 lanes (free: done once, outside the jit).
# ---------------------------------------------------------------------------
def init_params(key, input_size, hidden_size, num_layers, output_size):
    H = hidden_size
    H2 = H // 2
    LANE = 128
    H2p = ((H2 + LANE - 1) // LANE) * LANE
    Op = ((output_size + LANE - 1) // LANE) * LANE

    bound = 1.0 / jnp.sqrt(jnp.float32(H))
    params = {"lstm": []}
    for layer in range(num_layers):
        in_f = input_size if layer == 0 else H
        key, k1, k2, k3, k4 = jax.random.split(key, 5)
        w_ih = jax.random.uniform(k1, (4 * H, in_f), jnp.float32, -bound, bound)
        w_hh = jax.random.uniform(k2, (4 * H, H), jnp.float32, -bound, bound)
        b_ih = jax.random.uniform(k3, (4 * H,), jnp.float32, -bound, bound)
        b_hh = jax.random.uniform(k4, (4 * H,), jnp.float32, -bound, bound)
        params["lstm"].append(
            {
                "wih_t": w_ih.T,                        # (in_f, 4H)
                "whh_t": w_hh.T,                        # (H, 4H)
                "b": (b_ih + b_hh).reshape(1, 4 * H),   # (1, 4H)
            }
        )

    key, k1, k2, k3, k4 = jax.random.split(key, 5)
    b1f = 1.0 / jnp.sqrt(jnp.float32(H))
    b2f = 1.0 / jnp.sqrt(jnp.float32(H2))
    w1 = jax.random.uniform(k1, (H2, H), jnp.float32, -b1f, b1f)
    b1 = jax.random.uniform(k2, (H2,), jnp.float32, -b1f, b1f)
    w2 = jax.random.uniform(k3, (output_size, H2), jnp.float32, -b2f, b2f)
    b2 = jax.random.uniform(k4, (output_size,), jnp.float32, -b2f, b2f)

    # Lane-dense padding: extra fc1 columns are zero (and ReLU(0)=0); extra
    # fc2 rows are zero, so padded lanes never change the real outputs.
    params["w1_t"] = jnp.pad(w1.T, ((0, 0), (0, H2p - H2)))           # (H, H2p)
    params["b1"] = jnp.pad(b1, (0, H2p - H2)).reshape(1, H2p)         # (1, H2p)
    params["w2_t"] = jnp.pad(
        w2.T, ((0, H2p - H2), (0, Op - output_size))
    )                                                                  # (H2p, Op)
    params["b2"] = jnp.pad(b2, (0, Op - output_size)).reshape(1, Op)   # (1, Op)
    return params


# ---------------------------------------------------------------------------
# Pure-JAX reference (for correctness check)
# ---------------------------------------------------------------------------
def reference_forward(x, params, num_layers, hidden_size, output_size):
    B = x.shape[0]
    h_seq = x.astype(jnp.float32)
    for layer in range(num_layers):
        p = params["lstm"][layer]
        wih_t, whh_t, b = p["wih_t"], p["whh_t"], p["b"]

        def step(carry, x_t):
            h, c = carry
            gates = x_t @ wih_t + h @ whh_t + b
            H = hidden_size
            i = jax.nn.sigmoid(gates[:, :H])
            f = jax.nn.sigmoid(gates[:, H:2 * H])
            g = jnp.tanh(gates[:, 2 * H:3 * H])
            o = jax.nn.sigmoid(gates[:, 3 * H:])
            c = f * c + i * g
            h = o * jnp.tanh(c)
            return (h, c), h

        init = (jnp.zeros((B, hidden_size), jnp.float32),
                jnp.zeros((B, hidden_size), jnp.float32))
        _, hs = jax.lax.scan(step, init, jnp.transpose(h_seq, (1, 0, 2)))
        h_seq = jnp.transpose(hs, (1, 0, 2))
    last = h_seq[:, -1, :]
    h = jnp.maximum(last @ params["w1_t"] + params["b1"], 0.0)
    out = h @ params["w2_t"] + params["b2"]
    return out[:, :output_size]


# ---------------------------------------------------------------------------
if __name__ == "__main__":
    INPUT_SIZE = 4
    HIDDEN_SIZE = 32
    NUM_LAYERS = 2
    OUTPUT_SIZE = 1
    BATCH = 2
    SEQ_LEN = 8

    key = jax.random.PRNGKey(0)
    key, pkey, xkey = jax.random.split(key, 3)
    params = init_params(pkey, INPUT_SIZE, HIDDEN_SIZE, NUM_LAYERS, OUTPUT_SIZE)
    x = jax.random.normal(xkey, (BATCH, SEQ_LEN, INPUT_SIZE), jnp.float32)

    out = lstm_forecaster_forward(x, params, NUM_LAYERS, HIDDEN_SIZE, OUTPUT_SIZE)
    out = jax.block_until_ready(out)

    ref = reference_forward(x, params, NUM_LAYERS, HIDDEN_SIZE, OUTPUT_SIZE)
    assert out.shape == (BATCH, OUTPUT_SIZE), out.shape
    assert jnp.allclose(out, ref, atol=1e-4, rtol=1e-4), (out, ref)

    print("KERNEL_OK")
</pallas_src>

<mosaic_0001>
module attributes {stable_mosaic.version = 11 : i64} {
  func.func @kernel(%arg0: i32, %arg1: memref<2x8x4xf32, #tpu.memory_space<vmem>>, %arg2: memref<4x128xf32, #tpu.memory_space<vmem>>, %arg3: memref<32x128xf32, #tpu.memory_space<vmem>>, %arg4: memref<1x128xf32, #tpu.memory_space<vmem>>, %arg5: memref<32x128xf32, #tpu.memory_space<vmem>>, %arg6: memref<32x128xf32, #tpu.memory_space<vmem>>, %arg7: memref<1x128xf32, #tpu.memory_space<vmem>>, %arg8: memref<32x128xf32, #tpu.memory_space<vmem>>, %arg9: memref<1x128xf32, #tpu.memory_space<vmem>>, %arg10: memref<128x128xf32, #tpu.memory_space<vmem>>, %arg11: memref<1x128xf32, #tpu.memory_space<vmem>>, %arg12: memref<2x128xf32, #tpu.memory_space<vmem>>) attributes {dimension_semantics = [#tpu.dimension_semantics<parallel>], iteration_bounds = array<i64: 1>, scalar_prefetch = 0 : i64, scratch_operands = 0 : i64, tpu.core_type = #tpu.core_type<tc>, window_params = [{transform_indices = @transform_0, window_bounds = array<i64: 2, 8, 4>}, {pipeline_mode = #tpu.pipeline_mode<synchronous>, transform_indices = @transform_1, window_bounds = array<i64: 4, 128>}, {pipeline_mode = #tpu.pipeline_mode<synchronous>, transform_indices = @transform_2, window_bounds = array<i64: 32, 128>}, {pipeline_mode = #tpu.pipeline_mode<synchronous>, transform_indices = @transform_3, window_bounds = array<i64: 1, 128>}, {pipeline_mode = #tpu.pipeline_mode<synchronous>, transform_indices = @transform_4, window_bounds = array<i64: 32, 128>}, {pipeline_mode = #tpu.pipeline_mode<synchronous>, transform_indices = @transform_5, window_bounds = array<i64: 32, 128>}, {pipeline_mode = #tpu.pipeline_mode<synchronous>, transform_indices = @transform_6, window_bounds = array<i64: 1, 128>}, {pipeline_mode = #tpu.pipeline_mode<synchronous>, transform_indices = @transform_7, window_bounds = array<i64: 32, 128>}, {pipeline_mode = #tpu.pipeline_mode<synchronous>, transform_indices = @transform_8, window_bounds = array<i64: 1, 128>}, {pipeline_mode = #tpu.pipeline_mode<synchronous>, transform_indices = @transform_9, window_bounds = array<i64: 128, 128>}, {pipeline_mode = #tpu.pipeline_mode<synchronous>, transform_indices = @transform_10, window_bounds = array<i64: 1, 128>}, {transform_indices = @transform_11, window_bounds = array<i64: 2, 128>}]} {
    %c0 = arith.constant 0 : index
    %c0_0 = arith.constant 0 : index
    %c0_1 = arith.constant 0 : index
    %0 = vector.load %arg1[%c0, %c0_0, %c0_1] : memref<2x8x4xf32, #tpu.memory_space<vmem>>, vector<2x8x4xf32>
    %c0_2 = arith.constant 0 : index
    %c0_3 = arith.constant 0 : index
    %1 = vector.load %arg2[%c0_2, %c0_3] : memref<4x128xf32, #tpu.memory_space<vmem>>, vector<4x128xf32>
    %c0_4 = arith.constant 0 : index
    %c0_5 = arith.constant 0 : index
    %2 = vector.load %arg5[%c0_4, %c0_5] : memref<32x128xf32, #tpu.memory_space<vmem>>, vector<32x128xf32>
    %c0_6 = arith.constant 0 : index
    %c0_7 = arith.constant 0 : index
    %3 = vector.load %arg3[%c0_6, %c0_7] : memref<32x128xf32, #tpu.memory_space<vmem>>, vector<32x128xf32>
    %c0_8 = arith.constant 0 : index
    %c0_9 = arith.constant 0 : index
    %4 = vector.load %arg6[%c0_8, %c0_9] : memref<32x128xf32, #tpu.memory_space<vmem>>, vector<32x128xf32>
    %c0_10 = arith.constant 0 : index
    %c0_11 = arith.constant 0 : index
    %5 = vector.load %arg4[%c0_10, %c0_11] : memref<1x128xf32, #tpu.memory_space<vmem>>, vector<1x128xf32>
    %c0_12 = arith.constant 0 : index
    %c0_13 = arith.constant 0 : index
    %6 = vector.load %arg7[%c0_12, %c0_13] : memref<1x128xf32, #tpu.memory_space<vmem>>, vector<1x128xf32>
    %7 = vector.extract_strided_slice %0 {offsets = [0, 0, 0], sizes = [2, 1, 4], strides = [1, 1, 1]} : vector<2x8x4xf32> to vector<2x1x4xf32>
    %8 = vector.shape_cast %7 : vector<2x1x4xf32> to vector<2x4xf32>
    %cst = arith.constant dense<0.000000e+00> : vector<2x128xf32>
    %9 = tpu.matmul %8, %1, %cst {dimension_numbers = #tpu.dot_dimension_numbers<[1], [0], [0], [1], [0, 0, 1, 1], [], []>} : vector<2x4xf32>, vector<4x128xf32>, vector<2x128xf32> -> vector<2x128xf32>
    %10 = vector.broadcast %5 : vector<1x128xf32> to vector<2x128xf32>
    %11 = arith.addf %9, %10 : vector<2x128xf32>
    %12 = vector.extract_strided_slice %0 {offsets = [0, 1, 0], sizes = [2, 1, 4], strides = [1, 1, 1]} : vector<2x8x4xf32> to vector<2x1x4xf32>
    %13 = vector.shape_cast %12 : vector<2x1x4xf32> to vector<2x4xf32>
    %cst_14 = arith.constant dense<0.000000e+00> : vector<2x128xf32>
    %14 = tpu.matmul %13, %1, %cst_14 {dimension_numbers = #tpu.dot_dimension_numbers<[1], [0], [0], [1], [0, 0, 1, 1], [], []>} : vector<2x4xf32>, vector<4x128xf32>, vector<2x128xf32> -> vector<2x128xf32>
    %15 = vector.broadcast %5 : vector<1x128xf32> to vector<2x128xf32>
    %16 = arith.addf %14, %15 : vector<2x128xf32>
    %17 = vector.extract_strided_slice %0 {offsets = [0, 2, 0], sizes = [2, 1, 4], strides = [1, 1, 1]} : vector<2x8x4xf32> to vector<2x1x4xf32>
    %18 = vector.shape_cast %17 : vector<2x1x4xf32> to vector<2x4xf32>
    %cst_15 = arith.constant dense<0.000000e+00> : vector<2x128xf32>
    %19 = tpu.matmul %18, %1, %cst_15 {dimension_numbers = #tpu.dot_dimension_numbers<[1], [0], [0], [1], [0, 0, 1, 1], [], []>} : vector<2x4xf32>, vector<4x128xf32>, vector<2x128xf32> -> vector<2x128xf32>
    %20 = vector.broadcast %5 : vector<1x128xf32> to vector<2x128xf32>
    %21 = arith.addf %19, %20 : vector<2x128xf32>
    %22 = vector.extract_strided_slice %0 {offsets = [0, 3, 0], sizes = [2, 1, 4], strides = [1, 1, 1]} : vector<2x8x4xf32> to vector<2x1x4xf32>
    %23 = vector.shape_cast %22 : vector<2x1x4xf32> to vector<2x4xf32>
    %cst_16 = arith.constant dense<0.000000e+00> : vector<2x128xf32>
    %24 = tpu.matmul %23, %1, %cst_16 {dimension_numbers = #tpu.dot_dimension_numbers<[1], [0], [0], [1], [0, 0, 1, 1], [], []>} : vector<2x4xf32>, vector<4x128xf32>, vector<2x128xf32> -> vector<2x128xf32>
    %25 = vector.broadcast %5 : vector<1x128xf32> to vector<2x128xf32>
    %26 = arith.addf %24, %25 : vector<2x128xf32>
    %27 = vector.extract_strided_slice %0 {offsets = [0, 4, 0], sizes = [2, 1, 4], strides = [1, 1, 1]} : vector<2x8x4xf32> to vector<2x1x4xf32>
    %28 = vector.shape_cast %27 : vector<2x1x4xf32> to vector<2x4xf32>
    %cst_17 = arith.constant dense<0.000000e+00> : vector<2x128xf32>
    %29 = tpu.matmul %28, %1, %cst_17 {dimension_numbers = #tpu.dot_dimension_numbers<[1], [0], [0], [1], [0, 0, 1, 1], [], []>} : vector<2x4xf32>, vector<4x128xf32>, vector<2x128xf32> -> vector<2x128xf32>
    %30 = vector.broadcast %5 : vector<1x128xf32> to vector<2x128xf32>
    %31 = arith.addf %29, %30 : vector<2x128xf32>
    %32 = vector.extract_strided_slice %0 {offsets = [0, 5, 0], sizes = [2, 1, 4], strides = [1, 1, 1]} : vector<2x8x4xf32> to vector<2x1x4xf32>
    %33 = vector.shape_cast %32 : vector<2x1x4xf32> to vector<2x4xf32>
    %cst_18 = arith.constant dense<0.000000e+00> : vector<2x128xf32>
    %34 = tpu.matmul %33, %1, %cst_18 {dimension_numbers = #tpu.dot_dimension_numbers<[1], [0], [0], [1], [0, 0, 1, 1], [], []>} : vector<2x4xf32>, vector<4x128xf32>, vector<2x128xf32> -> vector<2x128xf32>
    %35 = vector.broadcast %5 : vector<1x128xf32> to vector<2x128xf32>
    %36 = arith.addf %34, %35 : vector<2x128xf32>
    %37 = vector.extract_strided_slice %0 {offsets = [0, 6, 0], sizes = [2, 1, 4], strides = [1, 1, 1]} : vector<2x8x4xf32> to vector<2x1x4xf32>
    %38 = vector.shape_cast %37 : vector<2x1x4xf32> to vector<2x4xf32>
    %cst_19 = arith.constant dense<0.000000e+00> : vector<2x128xf32>
    %39 = tpu.matmul %38, %1, %cst_19 {dimension_numbers = #tpu.dot_dimension_numbers<[1], [0], [0], [1], [0, 0, 1, 1], [], []>} : vector<2x4xf32>, vector<4x128xf32>, vector<2x128xf32> -> vector<2x128xf32>
    %40 = vector.broadcast %5 : vector<1x128xf32> to vector<2x128xf32>
    %41 = arith.addf %39, %40 : vector<2x128xf32>
    %42 = vector.extract_strided_slice %0 {offsets = [0, 7, 0], sizes = [2, 1, 4], strides = [1, 1, 1]} : vector<2x8x4xf32> to vector<2x1x4xf32>
    %43 = vector.shape_cast %42 : vector<2x1x4xf32> to vector<2x4xf32>
    %cst_20 = arith.constant dense<0.000000e+00> : vector<2x128xf32>
    %44 = tpu.matmul %43, %1, %cst_20 {dimension_numbers = #tpu.dot_dimension_numbers<[1], [0], [0], [1], [0, 0, 1, 1], [], []>} : vector<2x4xf32>, vector<4x128xf32>, vector<2x128xf32> -> vector<2x128xf32>
    %45 = vector.broadcast %5 : vector<1x128xf32> to vector<2x128xf32>
    %46 = arith.addf %44, %45 : vector<2x128xf32>
    %cst_21 = arith.constant 0.000000e+00 : f32
    %47 = vector.broadcast %cst_21 : f32 to vector<2x32xf32>
    %cst_22 = arith.constant 0.000000e+00 : f32
    %48 = vector.broadcast %cst_22 : f32 to vector<2x32xf32>
    %cst_23 = arith.constant 0.000000e+00 : f32
    %49 = vector.broadcast %cst_23 : f32 to vector<2x32xf32>
    %cst_24 = arith.constant 0.000000e+00 : f32
    %50 = vector.broadcast %cst_24 : f32 to vector<2x32xf32>
    %cst_25 = arith.constant dense<0.000000e+00> : vector<2x128xf32>
    %51 = tpu.matmul %47, %3, %cst_25 {dimension_numbers = #tpu.dot_dimension_numbers<[1], [0], [0], [1], [0, 0, 1, 1], [], []>} : vector<2x32xf32>, vector<32x128xf32>, vector<2x128xf32> -> vector<2x128xf32>
    %52 = arith.addf %11, %51 : vector<2x128xf32>
    %53 = arith.negf %52 : vector<2x128xf32>
    %54 = math.exp %53 : vector<2x128xf32>
    %cst_26 = arith.constant 1.000000e+00 : f32
    %55 = vector.broadcast %cst_26 : f32 to vector<2x128xf32>
    %56 = arith.addf %55, %54 : vector<2x128xf32>
    %57 = arith.divf %55, %56 : vector<2x128xf32>
    %58 = math.tanh %52 : vector<2x128xf32>
    %59 = vector.extract_strided_slice %57 {offsets = [0, 0], sizes = [2, 32], strides = [1, 1]} : vector<2x128xf32> to vector<2x32xf32>
    %60 = vector.extract_strided_slice %57 {offsets = [0, 32], sizes = [2, 32], strides = [1, 1]} : vector<2x128xf32> to vector<2x32xf32>
    %61 = vector.extract_strided_slice %58 {offsets = [0, 64], sizes = [2, 32], strides = [1, 1]} : vector<2x128xf32> to vector<2x32xf32>
    %62 = vector.extract_strided_slice %57 {offsets = [0, 96], sizes = [2, 32], strides = [1, 1]} : vector<2x128xf32> to vector<2x32xf32>
    %63 = arith.mulf %60, %49 : vector<2x32xf32>
    %64 = arith.mulf %59, %61 : vector<2x32xf32>
    %65 = arith.addf %63, %64 : vector<2x32xf32>
    %66 = math.tanh %65 : vector<2x32xf32>
    %67 = arith.mulf %62, %66 : vector<2x32xf32>
    %cst_27 = arith.constant dense<0.000000e+00> : vector<2x128xf32>
    %68 = tpu.matmul %67, %3, %cst_27 {dimension_numbers = #tpu.dot_dimension_numbers<[1], [0], [0], [1], [0, 0, 1, 1], [], []>} : vector<2x32xf32>, vector<32x128xf32>, vector<2x128xf32> -> vector<2x128xf32>
    %69 = arith.addf %16, %68 : vector<2x128xf32>
    %70 = arith.negf %69 : vector<2x128xf32>
    %71 = math.exp %70 : vector<2x128xf32>
    %cst_28 = arith.constant 1.000000e+00 : f32
    %72 = vector.broadcast %cst_28 : f32 to vector<2x128xf32>
    %73 = arith.addf %72, %71 : vector<2x128xf32>
    %74 = arith.divf %72, %73 : vector<2x128xf32>
    %75 = math.tanh %69 : vector<2x128xf32>
    %76 = vector.extract_strided_slice %74 {offsets = [0, 0], sizes = [2, 32], strides = [1, 1]} : vector<2x128xf32> to vector<2x32xf32>
    %77 = vector.extract_strided_slice %74 {offsets = [0, 32], sizes = [2, 32], strides = [1, 1]} : vector<2x128xf32> to vector<2x32xf32>
    %78 = vector.extract_strided_slice %75 {offsets = [0, 64], sizes = [2, 32], strides = [1, 1]} : vector<2x128xf32> to vector<2x32xf32>
    %79 = vector.extract_strided_slice %74 {offsets = [0, 96], sizes = [2, 32], strides = [1, 1]} : vector<2x128xf32> to vector<2x32xf32>
    %80 = arith.mulf %77, %65 : vector<2x32xf32>
    %81 = arith.mulf %76, %78 : vector<2x32xf32>
    %82 = arith.addf %80, %81 : vector<2x32xf32>
    %83 = math.tanh %82 : vector<2x32xf32>
    %84 = arith.mulf %79, %83 : vector<2x32xf32>
    %cst_29 = arith.constant dense<0.000000e+00> : vector<2x128xf32>
    %85 = tpu.matmul %67, %2, %cst_29 {dimension_numbers = #tpu.dot_dimension_numbers<[1], [0], [0], [1], [0, 0, 1, 1], [], []>} : vector<2x32xf32>, vector<32x128xf32>, vector<2x128xf32> -> vector<2x128xf32>
    %cst_30 = arith.constant dense<0.000000e+00> : vector<2x128xf32>
    %86 = tpu.matmul %48, %4, %cst_30 {dimension_numbers = #tpu.dot_dimension_numbers<[1], [0], [0], [1], [0, 0, 1, 1], [], []>} : vector<2x32xf32>, vector<32x128xf32>, vector<2x128xf32> -> vector<2x128xf32>
    %87 = arith.addf %85, %86 : vector<2x128xf32>
    %88 = vector.broadcast %6 : vector<1x128xf32> to vector<2x128xf32>
    %89 = arith.addf %87, %88 : vector<2x128xf32>
    %90 = arith.negf %89 : vector<2x128xf32>
    %91 = math.exp %90 : vector<2x128xf32>
    %cst_31 = arith.constant 1.000000e+00 : f32
    %92 = vector.broadcast %cst_31 : f32 to vector<2x128xf32>
    %93 = arith.addf %92, %91 : vector<2x128xf32>
    %94 = arith.divf %92, %93 : vector<2x128xf32>
    %95 = math.tanh %89 : vector<2x128xf32>
    %96 = vector.extract_strided_slice %94 {offsets = [0, 0], sizes = [2, 32], strides = [1, 1]} : vector<2x128xf32> to vector<2x32xf32>
    %97 = vector.extract_strided_slice %94 {offsets = [0, 32], sizes = [2, 32], strides = [1, 1]} : vector<2x128xf32> to vector<2x32xf32>
    %98 = vector.extract_strided_slice %95 {offsets = [0, 64], sizes = [2, 32], strides = [1, 1]} : vector<2x128xf32> to vector<2x32xf32>
    %99 = vector.extract_strided_slice %94 {offsets = [0, 96], sizes = [2, 32], strides = [1, 1]} : vector<2x128xf32> to vector<2x32xf32>
    %100 = arith.mulf %97, %50 : vector<2x32xf32>
    %101 = arith.mulf %96, %98 : vector<2x32xf32>
    %102 = arith.addf %100, %101 : vector<2x32xf32>
    %103 = math.tanh %102 : vector<2x32xf32>
    %104 = arith.mulf %99, %103 : vector<2x32xf32>
    %cst_32 = arith.constant dense<0.000000e+00> : vector<2x128xf32>
    %105 = tpu.matmul %84, %3, %cst_32 {dimension_numbers = #tpu.dot_dimension_numbers<[1], [0], [0], [1], [0, 0, 1, 1], [], []>} : vector<2x32xf32>, vector<32x128xf32>, vector<2x128xf32> -> vector<2x128xf32>
    %106 = arith.addf %21, %105 : vector<2x128xf32>
    %107 = arith.negf %106 : vector<2x128xf32>
    %108 = math.exp %107 : vector<2x128xf32>
    %cst_33 = arith.constant 1.000000e+00 : f32
    %109 = vector.broadcast %cst_33 : f32 to vector<2x128xf32>
    %110 = arith.addf %109, %108 : vector<2x128xf32>
    %111 = arith.divf %109, %110 : vector<2x128xf32>
    %112 = math.tanh %106 : vector<2x128xf32>
    %113 = vector.extract_strided_slice %111 {offsets = [0, 0], sizes = [2, 32], strides = [1, 1]} : vector<2x128xf32> to vector<2x32xf32>
    %114 = vector.extract_strided_slice %111 {offsets = [0, 32], sizes = [2, 32], strides = [1, 1]} : vector<2x128xf32> to vector<2x32xf32>
    %115 = vector.extract_strided_slice %112 {offsets = [0, 64], sizes = [2, 32], strides = [1, 1]} : vector<2x128xf32> to vector<2x32xf32>
    %116 = vector.extract_strided_slice %111 {offsets = [0, 96], sizes = [2, 32], strides = [1, 1]} : vector<2x128xf32> to vector<2x32xf32>
    %117 = arith.mulf %114, %82 : vector<2x32xf32>
    %118 = arith.mulf %113, %115 : vector<2x32xf32>
    %119 = arith.addf %117, %118 : vector<2x32xf32>
    %120 = math.tanh %119 : vector<2x32xf32>
    %121 = arith.mulf %116, %120 : vector<2x32xf32>
    %cst_34 = arith.constant dense<0.000000e+00> : vector<2x128xf32>
    %122 = tpu.matmul %84, %2, %cst_34 {dimension_numbers = #tpu.dot_dimension_numbers<[1], [0], [0], [1], [0, 0, 1, 1], [], []>} : vector<2x32xf32>, vector<32x128xf32>, vector<2x128xf32> -> vector<2x128xf32>
    %cst_35 = arith.constant dense<0.000000e+00> : vector<2x128xf32>
    %123 = tpu.matmul %104, %4, %cst_35 {dimension_numbers = #tpu.dot_dimension_numbers<[1], [0], [0], [1], [0, 0, 1, 1], [], []>} : vector<2x32xf32>, vector<32x128xf32>, vector<2x128xf32> -> vector<2x128xf32>
    %124 = arith.addf %122, %123 : vector<2x128xf32>
    %125 = vector.broadcast %6 : vector<1x128xf32> to vector<2x128xf32>
    %126 = arith.addf %124, %125 : vector<2x128xf32>
    %127 = arith.negf %126 : vector<2x128xf32>
    %128 = math.exp %127 : vector<2x128xf32>
    %cst_36 = arith.constant 1.000000e+00 : f32
    %129 = vector.broadcast %cst_36 : f32 to vector<2x128xf32>
    %130 = arith.addf %129, %128 : vector<2x128xf32>
    %131 = arith.divf %129, %130 : vector<2x128xf32>
    %132 = math.tanh %126 : vector<2x128xf32>
    %133 = vector.extract_strided_slice %131 {offsets = [0, 0], sizes = [2, 32], strides = [1, 1]} : vector<2x128xf32> to vector<2x32xf32>
    %134 = vector.extract_strided_slice %131 {offsets = [0, 32], sizes = [2, 32], strides = [1, 1]} : vector<2x128xf32> to vector<2x32xf32>
    %135 = vector.extract_strided_slice %132 {offsets = [0, 64], sizes = [2, 32], strides = [1, 1]} : vector<2x128xf32> to vector<2x32xf32>
    %136 = vector.extract_strided_slice %131 {offsets = [0, 96], sizes = [2, 32], strides = [1, 1]} : vector<2x128xf32> to vector<2x32xf32>
    %137 = arith.mulf %134, %102 : vector<2x32xf32>
    %138 = arith.mulf %133, %135 : vector<2x32xf32>
    %139 = arith.addf %137, %138 : vector<2x32xf32>
    %140 = math.tanh %139 : vector<2x32xf32>
    %141 = arith.mulf %136, %140 : vector<2x32xf32>
    %cst_37 = arith.constant dense<0.000000e+00> : vector<2x128xf32>
    %142 = tpu.matmul %121, %3, %cst_37 {dimension_numbers = #tpu.dot_dimension_numbers<[1], [0], [0], [1], [0, 0, 1, 1], [], []>} : vector<2x32xf32>, vector<32x128xf32>, vector<2x128xf32> -> vector<2x128xf32>
    %143 = arith.addf %26, %142 : vector<2x128xf32>
    %144 = arith.negf %143 : vector<2x128xf32>
    %145 = math.exp %144 : vector<2x128xf32>
    %cst_38 = arith.constant 1.000000e+00 : f32
    %146 = vector.broadcast %cst_38 : f32 to vector<2x128xf32>
    %147 = arith.addf %146, %145 : vector<2x128xf32>
    %148 = arith.divf %146, %147 : vector<2x128xf32>
    %149 = math.tanh %143 : vector<2x128xf32>
    %150 = vector.extract_strided_slice %148 {offsets = [0, 0], sizes = [2, 32], strides = [1, 1]} : vector<2x128xf32> to vector<2x32xf32>
    %151 = vector.extract_strided_slice %148 {offsets = [0, 32], sizes = [2, 32], strides = [1, 1]} : vector<2x128xf32> to vector<2x32xf32>
    %152 = vector.extract_strided_slice %149 {offsets = [0, 64], sizes = [2, 32], strides = [1, 1]} : vector<2x128xf32> to vector<2x32xf32>
    %153 = vector.extract_strided_slice %148 {offsets = [0, 96], sizes = [2, 32], strides = [1, 1]} : vector<2x128xf32> to vector<2x32xf32>
    %154 = arith.mulf %151, %119 : vector<2x32xf32>
    %155 = arith.mulf %150, %152 : vector<2x32xf32>
    %156 = arith.addf %154, %155 : vector<2x32xf32>
    %157 = math.tanh %156 : vector<2x32xf32>
    %158 = arith.mulf %153, %157 : vector<2x32xf32>
    %cst_39 = arith.constant dense<0.000000e+00> : vector<2x128xf32>
    %159 = tpu.matmul %121, %2, %cst_39 {dimension_numbers = #tpu.dot_dimension_numbers<[1], [0], [0], [1], [0, 0, 1, 1], [], []>} : vector<2x32xf32>, vector<32x128xf32>, vector<2x128xf32> -> vector<2x128xf32>
    %cst_40 = arith.constant dense<0.000000e+00> : vector<2x128xf32>
    %160 = tpu.matmul %141, %4, %cst_40 {dimension_numbers = #tpu.dot_dimension_numbers<[1], [0], [0], [1], [0, 0, 1, 1], [], []>} : vector<2x32xf32>, vector<32x128xf32>, vector<2x128xf32> -> vector<2x128xf32>
    %161 = arith.addf %159, %160 : vector<2x128xf32>
    %162 = vector.broadcast %6 : vector<1x128xf32> to vector<2x128xf32>
    %163 = arith.addf %161, %162 : vector<2x128xf32>
    %164 = arith.negf %163 : vector<2x128xf32>
    %165 = math.exp %164 : vector<2x128xf32>
    %cst_41 = arith.constant 1.000000e+00 : f32
    %166 = vector.broadcast %cst_41 : f32 to vector<2x128xf32>
    %167 = arith.addf %166, %165 : vector<2x128xf32>
    %168 = arith.divf %166, %167 : vector<2x128xf32>
    %169 = math.tanh %163 : vector<2x128xf32>
    %170 = vector.extract_strided_slice %168 {offsets = [0, 0], sizes = [2, 32], strides = [1, 1]} : vector<2x128xf32> to vector<2x32xf32>
    %171 = vector.extract_strided_slice %168 {offsets = [0, 32], sizes = [2, 32], strides = [1, 1]} : vector<2x128xf32> to vector<2x32xf32>
    %172 = vector.extract_strided_slice %169 {offsets = [0, 64], sizes = [2, 32], strides = [1, 1]} : vector<2x128xf32> to vector<2x32xf32>
    %173 = vector.extract_strided_slice %168 {offsets = [0, 96], sizes = [2, 32], strides = [1, 1]} : vector<2x128xf32> to vector<2x32xf32>
    %174 = arith.mulf %171, %139 : vector<2x32xf32>
    %175 = arith.mulf %170, %172 : vector<2x32xf32>
    %176 = arith.addf %174, %175 : vector<2x32xf32>
    %177 = math.tanh %176 : vector<2x32xf32>
    %178 = arith.mulf %173, %177 : vector<2x32xf32>
    %cst_42 = arith.constant dense<0.000000e+00> : vector<2x128xf32>
    %179 = tpu.matmul %158, %3, %cst_42 {dimension_numbers = #tpu.dot_dimension_numbers<[1], [0], [0], [1], [0, 0, 1, 1], [], []>} : vector<2x32xf32>, vector<32x128xf32>, vector<2x128xf32> -> vector<2x128xf32>
    %180 = arith.addf %31, %179 : vector<2x128xf32>
    %181 = arith.negf %180 : vector<2x128xf32>
    %182 = math.exp %181 : vector<2x128xf32>
    %cst_43 = arith.constant 1.000000e+00 : f32
    %183 = vector.broadcast %cst_43 : f32 to vector<2x128xf32>
    %184 = arith.addf %183, %182 : vector<2x128xf32>
    %185 = arith.divf %183, %184 : vector<2x128xf32>
    %186 = math.tanh %180 : vector<2x128xf32>
    %187 = vector.extract_strided_slice %185 {offsets = [0, 0], sizes = [2, 32], strides = [1, 1]} : vector<2x128xf32> to vector<2x32xf32>
    %188 = vector.extract_strided_slice %185 {offsets = [0, 32], sizes = [2, 32], strides = [1, 1]} : vector<2x128xf32> to vector<2x32xf32>
    %189 = vector.extract_strided_slice %186 {offsets = [0, 64], sizes = [2, 32], strides = [1, 1]} : vector<2x128xf32> to vector<2x32xf32>
    %190 = vector.extract_strided_slice %185 {offsets = [0, 96], sizes = [2, 32], strides = [1, 1]} : vector<2x128xf32> to vector<2x32xf32>
    %191 = arith.mulf %188, %156 : vector<2x32xf32>
    %192 = arith.mulf %187, %189 : vector<2x32xf32>
    %193 = arith.addf %191, %192 : vector<2x32xf32>
    %194 = math.tanh %193 : vector<2x32xf32>
    %195 = arith.mulf %190, %194 : vector<2x32xf32>
    %cst_44 = arith.constant dense<0.000000e+00> : vector<2x128xf32>
    %196 = tpu.matmul %158, %2, %cst_44 {dimension_numbers = #tpu.dot_dimension_numbers<[1], [0], [0], [1], [0, 0, 1, 1], [], []>} : vector<2x32xf32>, vector<32x128xf32>, vector<2x128xf32> -> vector<2x128xf32>
    %cst_45 = arith.constant dense<0.000000e+00> : vector<2x128xf32>
    %197 = tpu.matmul %178, %4, %cst_45 {dimension_numbers = #tpu.dot_dimension_numbers<[1], [0], [0], [1], [0, 0, 1, 1], [], []>} : vector<2x32xf32>, vector<32x128xf32>, vector<2x128xf32> -> vector<2x128xf32>
    %198 = arith.addf %196, %197 : vector<2x128xf32>
    %199 = vector.broadcast %6 : vector<1x128xf32> to vector<2x128xf32>
    %200 = arith.addf %198, %199 : vector<2x128xf32>
    %201 = arith.negf %200 : vector<2x128xf32>
    %202 = math.exp %201 : vector<2x128xf32>
    %cst_46 = arith.constant 1.000000e+00 : f32
    %203 = vector.broadcast %cst_46 : f32 to vector<2x128xf32>
    %204 = arith.addf %203, %202 : vector<2x128xf32>
    %205 = arith.divf %203, %204 : vector<2x128xf32>
    %206 = math.tanh %200 : vector<2x128xf32>
    %207 = vector.extract_strided_slice %205 {offsets = [0, 0], sizes = [2, 32], strides = [1, 1]} : vector<2x128xf32> to vector<2x32xf32>
    %208 = vector.extract_strided_slice %205 {offsets = [0, 32], sizes = [2, 32], strides = [1, 1]} : vector<2x128xf32> to vector<2x32xf32>
    %209 = vector.extract_strided_slice %206 {offsets = [0, 64], sizes = [2, 32], strides = [1, 1]} : vector<2x128xf32> to vector<2x32xf32>
    %210 = vector.extract_strided_slice %205 {offsets = [0, 96], sizes = [2, 32], strides = [1, 1]} : vector<2x128xf32> to vector<2x32xf32>
    %211 = arith.mulf %208, %176 : vector<2x32xf32>
    %212 = arith.mulf %207, %209 : vector<2x32xf32>
    %213 = arith.addf %211, %212 : vector<2x32xf32>
    %214 = math.tanh %213 : vector<2x32xf32>
    %215 = arith.mulf %210, %214 : vector<2x32xf32>
    %cst_47 = arith.constant dense<0.000000e+00> : vector<2x128xf32>
    %216 = tpu.matmul %195, %3, %cst_47 {dimension_numbers = #tpu.dot_dimension_numbers<[1], [0], [0], [1], [0, 0, 1, 1], [], []>} : vector<2x32xf32>, vector<32x128xf32>, vector<2x128xf32> -> vector<2x128xf32>
    %217 = arith.addf %36, %216 : vector<2x128xf32>
    %218 = arith.negf %217 : vector<2x128xf32>
    %219 = math.exp %218 : vector<2x128xf32>
    %cst_48 = arith.constant 1.000000e+00 : f32
    %220 = vector.broadcast %cst_48 : f32 to vector<2x128xf32>
    %221 = arith.addf %220, %219 : vector<2x128xf32>
    %222 = arith.divf %220, %221 : vector<2x128xf32>
    %223 = math.tanh %217 : vector<2x128xf32>
    %224 = vector.extract_strided_slice %222 {offsets = [0, 0], sizes = [2, 32], strides = [1, 1]} : vector<2x128xf32> to vector<2x32xf32>
    %225 = vector.extract_strided_slice %222 {offsets = [0, 32], sizes = [2, 32], strides = [1, 1]} : vector<2x128xf32> to vector<2x32xf32>
    %226 = vector.extract_strided_slice %223 {offsets = [0, 64], sizes = [2, 32], strides = [1, 1]} : vector<2x128xf32> to vector<2x32xf32>
    %227 = vector.extract_strided_slice %222 {offsets = [0, 96], sizes = [2, 32], strides = [1, 1]} : vector<2x128xf32> to vector<2x32xf32>
    %228 = arith.mulf %225, %193 : vector<2x32xf32>
    %229 = arith.mulf %224, %226 : vector<2x32xf32>
    %230 = arith.addf %228, %229 : vector<2x32xf32>
    %231 = math.tanh %230 : vector<2x32xf32>
    %232 = arith.mulf %227, %231 : vector<2x32xf32>
    %cst_49 = arith.constant dense<0.000000e+00> : vector<2x128xf32>
    %233 = tpu.matmul %195, %2, %cst_49 {dimension_numbers = #tpu.dot_dimension_numbers<[1], [0], [0], [1], [0, 0, 1, 1], [], []>} : vector<2x32xf32>, vector<32x128xf32>, vector<2x128xf32> -> vector<2x128xf32>
    %cst_50 = arith.constant dense<0.000000e+00> : vector<2x128xf32>
    %234 = tpu.matmul %215, %4, %cst_50 {dimension_numbers = #tpu.dot_dimension_numbers<[1], [0], [0], [1], [0, 0, 1, 1], [], []>} : vector<2x32xf32>, vector<32x128xf32>, vector<2x128xf32> -> vector<2x128xf32>
    %235 = arith.addf %233, %234 : vector<2x128xf32>
    %236 = vector.broadcast %6 : vector<1x128xf32> to vector<2x128xf32>
    %237 = arith.addf %235, %236 : vector<2x128xf32>
    %238 = arith.negf %237 : vector<2x128xf32>
    %239 = math.exp %238 : vector<2x128xf32>
    %cst_51 = arith.constant 1.000000e+00 : f32
    %240 = vector.broadcast %cst_51 : f32 to vector<2x128xf32>
    %241 = arith.addf %240, %239 : vector<2x128xf32>
    %242 = arith.divf %240, %241 : vector<2x128xf32>
    %243 = math.tanh %237 : vector<2x128xf32>
    %244 = vector.extract_strided_slice %242 {offsets = [0, 0], sizes = [2, 32], strides = [1, 1]} : vector<2x128xf32> to vector<2x32xf32>
    %245 = vector.extract_strided_slice %242 {offsets = [0, 32], sizes = [2, 32], strides = [1, 1]} : vector<2x128xf32> to vector<2x32xf32>
    %246 = vector.extract_strided_slice %243 {offsets = [0, 64], sizes = [2, 32], strides = [1, 1]} : vector<2x128xf32> to vector<2x32xf32>
    %247 = vector.extract_strided_slice %242 {offsets = [0, 96], sizes = [2, 32], strides = [1, 1]} : vector<2x128xf32> to vector<2x32xf32>
    %248 = arith.mulf %245, %213 : vector<2x32xf32>
    %249 = arith.mulf %244, %246 : vector<2x32xf32>
    %250 = arith.addf %248, %249 : vector<2x32xf32>
    %251 = math.tanh %250 : vector<2x32xf32>
    %252 = arith.mulf %247, %251 : vector<2x32xf32>
    %cst_52 = arith.constant dense<0.000000e+00> : vector<2x128xf32>
    %253 = tpu.matmul %232, %3, %cst_52 {dimension_numbers = #tpu.dot_dimension_numbers<[1], [0], [0], [1], [0, 0, 1, 1], [], []>} : vector<2x32xf32>, vector<32x128xf32>, vector<2x128xf32> -> vector<2x128xf32>
    %254 = arith.addf %41, %253 : vector<2x128xf32>
    %255 = arith.negf %254 : vector<2x128xf32>
    %256 = math.exp %255 : vector<2x128xf32>
    %cst_53 = arith.constant 1.000000e+00 : f32
    %257 = vector.broadcast %cst_53 : f32 to vector<2x128xf32>
    %258 = arith.addf %257, %256 : vector<2x128xf32>
    %259 = arith.divf %257, %258 : vector<2x128xf32>
    %260 = math.tanh %254 : vector<2x128xf32>
    %261 = vector.extract_strided_slice %259 {offsets = [0, 0], sizes = [2, 32], strides = [1, 1]} : vector<2x128xf32> to vector<2x32xf32>
    %262 = vector.extract_strided_slice %259 {offsets = [0, 32], sizes = [2, 32], strides = [1, 1]} : vector<2x128xf32> to vector<2x32xf32>
    %263 = vector.extract_strided_slice %260 {offsets = [0, 64], sizes = [2, 32], strides = [1, 1]} : vector<2x128xf32> to vector<2x32xf32>
    %264 = vector.extract_strided_slice %259 {offsets = [0, 96], sizes = [2, 32], strides = [1, 1]} : vector<2x128xf32> to vector<2x32xf32>
    %265 = arith.mulf %262, %230 : vector<2x32xf32>
    %266 = arith.mulf %261, %263 : vector<2x32xf32>
    %267 = arith.addf %265, %266 : vector<2x32xf32>
    %268 = math.tanh %267 : vector<2x32xf32>
    %269 = arith.mulf %264, %268 : vector<2x32xf32>
    %cst_54 = arith.constant dense<0.000000e+00> : vector<2x128xf32>
    %270 = tpu.matmul %232, %2, %cst_54 {dimension_numbers = #tpu.dot_dimension_numbers<[1], [0], [0], [1], [0, 0, 1, 1], [], []>} : vector<2x32xf32>, vector<32x128xf32>, vector<2x128xf32> -> vector<2x128xf32>
    %cst_55 = arith.constant dense<0.000000e+00> : vector<2x128xf32>
    %271 = tpu.matmul %252, %4, %cst_55 {dimension_numbers = #tpu.dot_dimension_numbers<[1], [0], [0], [1], [0, 0, 1, 1], [], []>} : vector<2x32xf32>, vector<32x128xf32>, vector<2x128xf32> -> vector<2x128xf32>
    %272 = arith.addf %270, %271 : vector<2x128xf32>
    %273 = vector.broadcast %6 : vector<1x128xf32> to vector<2x128xf32>
    %274 = arith.addf %272, %273 : vector<2x128xf32>
    %275 = arith.negf %274 : vector<2x128xf32>
    %276 = math.exp %275 : vector<2x128xf32>
    %cst_56 = arith.constant 1.000000e+00 : f32
    %277 = vector.broadcast %cst_56 : f32 to vector<2x128xf32>
    %278 = arith.addf %277, %276 : vector<2x128xf32>
    %279 = arith.divf %277, %278 : vector<2x128xf32>
    %280 = math.tanh %274 : vector<2x128xf32>
    %281 = vector.extract_strided_slice %279 {offsets = [0, 0], sizes = [2, 32], strides = [1, 1]} : vector<2x128xf32> to vector<2x32xf32>
    %282 = vector.extract_strided_slice %279 {offsets = [0, 32], sizes = [2, 32], strides = [1, 1]} : vector<2x128xf32> to vector<2x32xf32>
    %283 = vector.extract_strided_slice %280 {offsets = [0, 64], sizes = [2, 32], strides = [1, 1]} : vector<2x128xf32> to vector<2x32xf32>
    %284 = vector.extract_strided_slice %279 {offsets = [0, 96], sizes = [2, 32], strides = [1, 1]} : vector<2x128xf32> to vector<2x32xf32>
    %285 = arith.mulf %282, %250 : vector<2x32xf32>
    %286 = arith.mulf %281, %283 : vector<2x32xf32>
    %287 = arith.addf %285, %286 : vector<2x32xf32>
    %288 = math.tanh %287 : vector<2x32xf32>
    %289 = arith.mulf %284, %288 : vector<2x32xf32>
    %cst_57 = arith.constant dense<0.000000e+00> : vector<2x128xf32>
    %290 = tpu.matmul %269, %3, %cst_57 {dimension_numbers = #tpu.dot_dimension_numbers<[1], [0], [0], [1], [0, 0, 1, 1], [], []>} : vector<2x32xf32>, vector<32x128xf32>, vector<2x128xf32> -> vector<2x128xf32>
    %291 = arith.addf %46, %290 : vector<2x128xf32>
    %292 = arith.negf %291 : vector<2x128xf32>
    %293 = math.exp %292 : vector<2x128xf32>
    %cst_58 = arith.constant 1.000000e+00 : f32
    %294 = vector.broadcast %cst_58 : f32 to vector<2x128xf32>
    %295 = arith.addf %294, %293 : vector<2x128xf32>
    %296 = arith.divf %294, %295 : vector<2x128xf32>
    %297 = math.tanh %291 : vector<2x128xf32>
    %298 = vector.extract_strided_slice %296 {offsets = [0, 0], sizes = [2, 32], strides = [1, 1]} : vector<2x128xf32> to vector<2x32xf32>
    %299 = vector.extract_strided_slice %296 {offsets = [0, 32], sizes = [2, 32], strides = [1, 1]} : vector<2x128xf32> to vector<2x32xf32>
    %300 = vector.extract_strided_slice %297 {offsets = [0, 64], sizes = [2, 32], strides = [1, 1]} : vector<2x128xf32> to vector<2x32xf32>
    %301 = vector.extract_strided_slice %296 {offsets = [0, 96], sizes = [2, 32], strides = [1, 1]} : vector<2x128xf32> to vector<2x32xf32>
    %302 = arith.mulf %299, %267 : vector<2x32xf32>
    %303 = arith.mulf %298, %300 : vector<2x32xf32>
    %304 = arith.addf %302, %303 : vector<2x32xf32>
    %305 = math.tanh %304 : vector<2x32xf32>
    %306 = arith.mulf %301, %305 : vector<2x32xf32>
    %cst_59 = arith.constant dense<0.000000e+00> : vector<2x128xf32>
    %307 = tpu.matmul %269, %2, %cst_59 {dimension_numbers = #tpu.dot_dimension_numbers<[1], [0], [0], [1], [0, 0, 1, 1], [], []>} : vector<2x32xf32>, vector<32x128xf32>, vector<2x128xf32> -> vector<2x128xf32>
    %cst_60 = arith.constant dense<0.000000e+00> : vector<2x128xf32>
    %308 = tpu.matmul %289, %4, %cst_60 {dimension_numbers = #tpu.dot_dimension_numbers<[1], [0], [0], [1], [0, 0, 1, 1], [], []>} : vector<2x32xf32>, vector<32x128xf32>, vector<2x128xf32> -> vector<2x128xf32>
    %309 = arith.addf %307, %308 : vector<2x128xf32>
    %310 = vector.broadcast %6 : vector<1x128xf32> to vector<2x128xf32>
    %311 = arith.addf %309, %310 : vector<2x128xf32>
    %312 = arith.negf %311 : vector<2x128xf32>
    %313 = math.exp %312 : vector<2x128xf32>
    %cst_61 = arith.constant 1.000000e+00 : f32
    %314 = vector.broadcast %cst_61 : f32 to vector<2x128xf32>
    %315 = arith.addf %314, %313 : vector<2x128xf32>
    %316 = arith.divf %314, %315 : vector<2x128xf32>
    %317 = math.tanh %311 : vector<2x128xf32>
    %318 = vector.extract_strided_slice %316 {offsets = [0, 0], sizes = [2, 32], strides = [1, 1]} : vector<2x128xf32> to vector<2x32xf32>
    %319 = vector.extract_strided_slice %316 {offsets = [0, 32], sizes = [2, 32], strides = [1, 1]} : vector<2x128xf32> to vector<2x32xf32>
    %320 = vector.extract_strided_slice %317 {offsets = [0, 64], sizes = [2, 32], strides = [1, 1]} : vector<2x128xf32> to vector<2x32xf32>
    %321 = vector.extract_strided_slice %316 {offsets = [0, 96], sizes = [2, 32], strides = [1, 1]} : vector<2x128xf32> to vector<2x32xf32>
    %322 = arith.mulf %319, %287 : vector<2x32xf32>
    %323 = arith.mulf %318, %320 : vector<2x32xf32>
    %324 = arith.addf %322, %323 : vector<2x32xf32>
    %325 = math.tanh %324 : vector<2x32xf32>
    %326 = arith.mulf %321, %325 : vector<2x32xf32>
    %cst_62 = arith.constant dense<0.000000e+00> : vector<2x128xf32>
    %327 = tpu.matmul %306, %2, %cst_62 {dimension_numbers = #tpu.dot_dimension_numbers<[1], [0], [0], [1], [0, 0, 1, 1], [], []>} : vector<2x32xf32>, vector<32x128xf32>, vector<2x128xf32> -> vector<2x128xf32>
    %cst_63 = arith.constant dense<0.000000e+00> : vector<2x128xf32>
    %328 = tpu.matmul %326, %4, %cst_63 {dimension_numbers = #tpu.dot_dimension_numbers<[1], [0], [0], [1], [0, 0, 1, 1], [], []>} : vector<2x32xf32>, vector<32x128xf32>, vector<2x128xf32> -> vector<2x128xf32>
    %329 = arith.addf %327, %328 : vector<2x128xf32>
    %330 = vector.broadcast %6 : vector<1x128xf32> to vector<2x128xf32>
    %331 = arith.addf %329, %330 : vector<2x128xf32>
    %332 = arith.negf %331 : vector<2x128xf32>
    %333 = math.exp %332 : vector<2x128xf32>
    %cst_64 = arith.constant 1.000000e+00 : f32
    %334 = vector.broadcast %cst_64 : f32 to vector<2x128xf32>
    %335 = arith.addf %334, %333 : vector<2x128xf32>
    %336 = arith.divf %334, %335 : vector<2x128xf32>
    %337 = math.tanh %331 : vector<2x128xf32>
    %338 = vector.extract_strided_slice %336 {offsets = [0, 0], sizes = [2, 32], strides = [1, 1]} : vector<2x128xf32> to vector<2x32xf32>
    %339 = vector.extract_strided_slice %336 {offsets = [0, 32], sizes = [2, 32], strides = [1, 1]} : vector<2x128xf32> to vector<2x32xf32>
    %340 = vector.extract_strided_slice %337 {offsets = [0, 64], sizes = [2, 32], strides = [1, 1]} : vector<2x128xf32> to vector<2x32xf32>
    %341 = vector.extract_strided_slice %336 {offsets = [0, 96], sizes = [2, 32], strides = [1, 1]} : vector<2x128xf32> to vector<2x32xf32>
    %342 = arith.mulf %339, %324 : vector<2x32xf32>
    %343 = arith.mulf %338, %340 : vector<2x32xf32>
    %344 = arith.addf %342, %343 : vector<2x32xf32>
    %345 = math.tanh %344 : vector<2x32xf32>
    %346 = arith.mulf %341, %345 : vector<2x32xf32>
    %c0_65 = arith.constant 0 : index
    %c0_66 = arith.constant 0 : index
    %347 = vector.load %arg8[%c0_65, %c0_66] : memref<32x128xf32, #tpu.memory_space<vmem>>, vector<32x128xf32>
    %cst_67 = arith.constant dense<0.000000e+00> : vector<2x128xf32>
    %348 = tpu.matmul %346, %347, %cst_67 {dimension_numbers = #tpu.dot_dimension_numbers<[1], [0], [0], [1], [0, 0, 1, 1], [], []>} : vector<2x32xf32>, vector<32x128xf32>, vector<2x128xf32> -> vector<2x128xf32>
    %c0_68 = arith.constant 0 : index
    %c0_69 = arith.constant 0 : index
    %349 = vector.load %arg9[%c0_68, %c0_69] : memref<1x128xf32, #tpu.memory_space<vmem>>, vector<1x128xf32>
    %350 = vector.broadcast %349 : vector<1x128xf32> to vector<2x128xf32>
    %351 = arith.addf %348, %350 : vector<2x128xf32>
    %cst_70 = arith.constant 0.000000e+00 : f32
    %352 = vector.broadcast %cst_70 : f32 to vector<2x128xf32>
    %353 = arith.maximumf %351, %352 : vector<2x128xf32>
    %c0_71 = arith.constant 0 : index
    %c0_72 = arith.constant 0 : index
    %354 = vector.load %arg10[%c0_71, %c0_72] : memref<128x128xf32, #tpu.memory_space<vmem>>, vector<128x128xf32>
    %cst_73 = arith.constant dense<0.000000e+00> : vector<2x128xf32>
    %355 = tpu.matmul %353, %354, %cst_73 {dimension_numbers = #tpu.dot_dimension_numbers<[1], [0], [0], [1], [0, 0, 1, 1], [], []>} : vector<2x128xf32>, vector<128x128xf32>, vector<2x128xf32> -> vector<2x128xf32>
    %c0_74 = arith.constant 0 : index
    %c0_75 = arith.constant 0 : index
    %356 = vector.load %arg11[%c0_74, %c0_75] : memref<1x128xf32, #tpu.memory_space<vmem>>, vector<1x128xf32>
    %357 = vector.broadcast %356 : vector<1x128xf32> to vector<2x128xf32>
    %358 = arith.addf %355, %357 : vector<2x128xf32>
    %c0_76 = arith.constant 0 : index
    %c0_77 = arith.constant 0 : index
    %359 = vector.load %arg12[%c0_76, %c0_77] : memref<2x128xf32, #tpu.memory_space<vmem>>, vector<2x128xf32>
    tpu.vector_store %arg12[%c0_76, %c0_77], %358 {strides = array<i32>} : memref<2x128xf32, #tpu.memory_space<vmem>>, vector<2x128xf32>,
    return
  }
  func.func @transform_0(%arg0: i32) -> (i32, i32, i32) {
    %c0_i32 = arith.constant 0 : i32
    %c0_i32_0 = arith.constant 0 : i32
    %c0_i32_1 = arith.constant 0 : i32
    return %arg0, %c0_i32, %c0_i32_0 : i32, i32, i32
  }
  func.func @transform_1(%arg0: i32) -> (i32, i32) {
    %c0_i32 = arith.constant 0 : i32
    %c0_i32_0 = arith.constant 0 : i32
    %c0_i32_1 = arith.constant 0 : i32
    return %c0_i32, %c0_i32_0 : i32, i32
  }
  func.func @transform_2(%arg0: i32) -> (i32, i32) {
    %c0_i32 = arith.constant 0 : i32
    %c0_i32_0 = arith.constant 0 : i32
    %c0_i32_1 = arith.constant 0 : i32
    return %c0_i32, %c0_i32_0 : i32, i32
  }
  func.func @transform_3(%arg0: i32) -> (i32, i32) {
    %c0_i32 = arith.constant 0 : i32
    %c0_i32_0 = arith.constant 0 : i32
    %c0_i32_1 = arith.constant 0 : i32
    return %c0_i32, %c0_i32_0 : i32, i32
  }
  func.func @transform_4(%arg0: i32) -> (i32, i32) {
    %c0_i32 = arith.constant 0 : i32
    %c0_i32_0 = arith.constant 0 : i32
    %c0_i32_1 = arith.constant 0 : i32
    return %c0_i32, %c0_i32_0 : i32, i32
  }
  func.func @transform_5(%arg0: i32) -> (i32, i32) {
    %c0_i32 = arith.constant 0 : i32
    %c0_i32_0 = arith.constant 0 : i32
    %c0_i32_1 = arith.constant 0 : i32
    return %c0_i32, %c0_i32_0 : i32, i32
  }
  func.func @transform_6(%arg0: i32) -> (i32, i32) {
    %c0_i32 = arith.constant 0 : i32
    %c0_i32_0 = arith.constant 0 : i32
    %c0_i32_1 = arith.constant 0 : i32
    return %c0_i32, %c0_i32_0 : i32, i32
  }
  func.func @transform_7(%arg0: i32) -> (i32, i32) {
    %c0_i32 = arith.constant 0 : i32
    %c0_i32_0 = arith.constant 0 : i32
    %c0_i32_1 = arith.constant 0 : i32
    return %c0_i32, %c0_i32_0 : i32, i32
  }
  func.func @transform_8(%arg0: i32) -> (i32, i32) {
    %c0_i32 = arith.constant 0 : i32
    %c0_i32_0 = arith.constant 0 : i32
    %c0_i32_1 = arith.constant 0 : i32
    return %c0_i32, %c0_i32_0 : i32, i32
  }
  func.func @transform_9(%arg0: i32) -> (i32, i32) {
    %c0_i32 = arith.constant 0 : i32
    %c0_i32_0 = arith.constant 0 : i32
    %c0_i32_1 = arith.constant 0 : i32
    return %c0_i32, %c0_i32_0 : i32, i32
  }
  func.func @transform_10(%arg0: i32) -> (i32, i32) {
    %c0_i32 = arith.constant 0 : i32
    %c0_i32_0 = arith.constant 0 : i32
    %c0_i32_1 = arith.constant 0 : i32
    return %c0_i32, %c0_i32_0 : i32, i32
  }
  func.func @transform_11(%arg0: i32) -> (i32, i32) {
    %c0_i32 = arith.constant 0 : i32
    %c0_i32_0 = arith.constant 0 : i32
    return %arg0, %c0_i32 : i32, i32
  }
}

</mosaic_0001>

<bundles_post_ra>
// kernel: lstm_forecaster_forward.1
= control target key start
LH: loop header
LB: loop body
LE: loop exit
PB: predicated region body
PF: predicated region fallthrough
CT: control target
= control target key end

     0   :  { %16 = vsyncpa [#allocation3], 0  ;;  %s4631_s0 = inlined_call_operand.vmem [shape: f32[2,8,4], index: 0, kind: input, shape index: {}]   ;;  %s4632_s1 = inlined_call_operand.vmem [shape: f32[4,128], index: 1, kind: input, shape index: {}]   ;;  %s4633_s2 = inlined_call_operand.hbm [shape: f32[32,128], index: 2, kind: input, shape index: {}]   ;;  %s4634_s3 = inlined_call_operand.vmem [shape: f32[1,128], index: 3, kind: input, shape index: {}]   ;;  %s4635_s4 = inlined_call_operand.vmem [shape: f32[32,128], index: 4, kind: input, shape index: {}]   ;;  %s4636_s5 = inlined_call_operand.hbm [shape: f32[32,128], index: 5, kind: input, shape index: {}]   ;;  %s4637_s6 = inlined_call_operand.vmem [shape: f32[1,128], index: 6, kind: input, shape index: {}]   ;;  %s4638_s7 = inlined_call_operand.hbm [shape: f32[32,128], index: 7, kind: input, shape index: {}]   ;;  %s4639_s8 = inlined_call_operand.hbm [shape: f32[1,128], index: 8, kind: input, shape index: {}]   ;;  %s4640_s9 = inlined_call_operand.hbm [shape: f32[128,128], index: 9, kind: input, shape index: {}]   ;;  %s4641_s10 = inlined_call_operand.hbm [shape: f32[1,128], index: 10, kind: input, shape index: {}]   ;;  %s4642_s11 = inlined_call_operand.vmem [shape: f32[2,128], index: 11, kind: output, shape index: {}]  }
   0x1   :  { %17 = vsyncpa [#allocation5], 0 }
   0x2   :  { %18 = vsyncpa [#allocation8], 0 }
   0x3   :  { %19 = vsyncpa [#allocation11], 0  ;;  %s3948_s17 = smov [#allocation4]   ;;  %s3949_s19 = smov [#allocation7]  }
   0x4   :  { %s45_s18 = sshll.u32 %s3948_s17, 4  ;;  %s72_s20 = sshll.u32 %s3949_s19, 4  ;;  %s46_s18 = int_to_ptr.vmem [resolvable:$true] %s45_s18  ;;  %s73_s20 = int_to_ptr.vmem [resolvable:$true] %s72_s20 }
   0x5   :  { %s3828_s21 = scalar_lea.vmem %s46_s18, 512  ;;  %p3833_p1 = scmp.lt.s32.totalorder %s46_s18, %s46_s18 }
   0x6   :  { %p3829_p0 = scmp.ne.s32.totalorder %s46_s18, %s3828_s21  ;;  %p3834_p2 = scmp.lt.s32.totalorder %s3828_s21, %s3828_s21 }
   0x8   :  { %p3835_p3 = por %p3834_p2, %p3833_p1 }
   0xa   :  { %p3836_p4 = pnand %p3835_p3, %p3829_p0 }
   0xc   :  { %3839 = shalt.err (!%p3836_p4)
}
   0xd   :  { %s3950_s22 = smov 128   ;;  %s3951_s23 = smov 8  }
   0xe   :  { %51 = dma.hbm_to_vmem [thread:$0]  %s4636_s5, 512, %s46_s18, [#allocation5], %s3950_s22, %s3950_s22, %s3951_s23  }
   0xf   :  { %s3848_s26 = scalar_lea.vmem %s73_s20, 16  ;;  %s3852_s27 = scalar_lea.vmem %s73_s20, 32 }
  0x10   :  { %p3849_p5 = scmp.ne.s32.totalorder %s73_s20, %s3848_s26  ;;  %p3853_p6 = scmp.lt.s32.totalorder %s73_s20, %s73_s20 }
  0x11   :  { %p3854_p7 = scmp.lt.s32.totalorder %s3852_s27, %s3848_s26 }
  0x13   :  { %p3855_p8 = por %p3854_p7, %p3853_p6 }
  0x15   :  { %p3856_p9 = pnand %p3855_p8, %p3849_p5 }
  0x17   :  { %3859 = shalt.err (!%p3856_p9)
}
  0x18   :  { %75 = dma.hbm_to_vmem [thread:$0]  %s4639_s8, 16, %s73_s20, [#allocation8]  }
  0x19   :  { %s3952_s30 = smov [#allocation2]   ;;  %s3953_s13 = smov [#allocation6]  }
  0x1a   :  { %s29_s12 = sshll.u32 %s3952_s30, 4  ;;  %s59_s14 = sshll.u32 %s3953_s13, 4  ;;  %s30_s12 = int_to_ptr.vmem [resolvable:$true] %s29_s12  ;;  %s60_s14 = int_to_ptr.vmem [resolvable:$true] %s59_s14 }
  0x1b   :  { %s3868_s15 = scalar_lea.vmem %s30_s12, 512  ;;  %p3873_p11 = scmp.lt.s32.totalorder %s30_s12, %s30_s12 }
  0x1c   :  { %p3869_p10 = scmp.ne.s32.totalorder %s30_s12, %s3868_s15  ;;  %p3874_p12 = scmp.lt.s32.totalorder %s3868_s15, %s3868_s15 }
  0x1e   :  { %p3875_p13 = por %p3874_p12, %p3873_p11 }
  0x20   :  { %p3876_p0 = pnand %p3875_p13, %p3869_p10 }
  0x22   :  { %3879 = shalt.err (!%p3876_p0)
}
  0x23   :  { %35 = dma.hbm_to_vmem [thread:$0]  %s4633_s2, 512, %s30_s12, [#allocation3], %s3950_s22, %s3950_s22, %s3951_s23  }
  0x24   :  { %s3888_s8 = scalar_lea.vmem %s60_s14, 512  ;;  %p3893_p2 = scmp.lt.s32.totalorder %s60_s14, %s60_s14 }
  0x25   :  { %p3889_p1 = scmp.ne.s32.totalorder %s60_s14, %s3888_s8  ;;  %p3894_p3 = scmp.lt.s32.totalorder %s3888_s8, %s3888_s8 }
  0x27   :  { %p3895_p4 = por %p3894_p3, %p3893_p2 }
  0x29   :  { %p3896_p5 = pnand %p3895_p4, %p3889_p1 }
  0x2b   :  { %3899 = shalt.err (!%p3896_p5)
}
  0x2c   :  { %65 = dma.hbm_to_vmem [thread:$0]  %s4638_s7, 512, %s60_s14, [#allocation5], %s3950_s22, %s3950_s22, %s3951_s23  }
  0x2d   :  { %s3954_s19 = smov [#allocation9]   ;;  %s3955_s21 = smov [#allocation10]  }
  0x2e   :  { %s81_s20 = sshll.u32 %s3954_s19, 4  ;;  %s94_s24 = sshll.u32 %s3955_s21, 4  ;;  %s82_s20 = int_to_ptr.vmem [resolvable:$true] %s81_s20  ;;  %s95_s24 = int_to_ptr.vmem [resolvable:$true] %s94_s24 }
  0x2f   :  { %s3908_s2 = scalar_lea.vmem %s82_s20, 2048  ;;  %p3913_p7 = scmp.lt.s32.totalorder %s82_s20, %s82_s20 }
  0x30   :  { %p3909_p6 = scmp.ne.s32.totalorder %s82_s20, %s3908_s2  ;;  %p3914_p8 = scmp.lt.s32.totalorder %s3908_s2, %s3908_s2 }
  0x32   :  { %p3915_p9 = por %p3914_p8, %p3913_p7 }
  0x34   :  { %p3916_p10 = pnand %p3915_p9, %p3909_p6 }
  0x36   :  { %3919 = shalt.err (!%p3916_p10)
}
  0x37   :  { %87 = dma.hbm_to_vmem [thread:$0]  %s4640_s9, 2048, %s82_s20, [#allocation8], %s3950_s22, %s3950_s22, %s3951_s23  }
  0x38   :  { %s3928_s7 = scalar_lea.vmem %s95_s24, 16  ;;  %s3932_s27 = scalar_lea.vmem %s95_s24, 32 }
  0x39   :  { %p3929_p11 = scmp.ne.s32.totalorder %s95_s24, %s3928_s7  ;;  %p3933_p12 = scmp.lt.s32.totalorder %s95_s24, %s95_s24 }
  0x3a   :  { %p3934_p13 = scmp.lt.s32.totalorder %s3932_s27, %s3928_s7 }
  0x3c   :  { %p3935_p0 = por %p3934_p13, %p3933_p12 }
  0x3e   :  { %p3936_p1 = pnand %p3935_p0, %p3929_p11 }
  0x40   :  { %3939 = shalt.err (!%p3936_p1)
}
  0x41   :  { %97 = dma.hbm_to_vmem [thread:$0]  %s4641_s10, 16, %s95_s24, [#allocation11]  }
  0x42   :  { %3940 = dma.done.wait [#allocation3], 512  }
  0x43   :  { %3941 = vsyncadd [#allocation3], 4294966784 }
  0x44   :  { %3942 = dma.done.wait [#allocation5], 1024  }
  0x45   :  { %3943 = vsyncadd [#allocation5], 4294966272 }
  0x46   :  { %3944 = dma.done.wait [#allocation8], 2064  }
  0x47   :  { %3945 = vsyncadd [#allocation8], 4294965232 }
  0x48   :  { %3946 = dma.done.wait [#allocation11], 16  }
  0x49   :  { %3947 = vsyncadd [#allocation11], 4294967280  ;;  %v3956_v0 = vmov 0.0   ;;  %vm3957_vm0 = vmmov 0   ;;  %vm147_vm1 = vcmask 1043456   ;;  %v4064_v2 = vld [vmem:[%s4631_s0] sm:$0xff] }
  0x4a   :  { %3316 = vmatprep.subr.mxu0 %v3956_v0  ;;  %3318 = vmatprep.mubr.msk.f32.mxu0 %vm3957_vm0, %v3956_v0  ;;  %v4059_v1 = vld [vmem:[%s4632_s1] sm:$0xf]  ;;  %v4069_v3 = vld [vmem:[%s4631_s0 + $0x8] sm:$0xff]  ;;  %vm142_vm2 = vcmask 1041409   ;;  %vm144_vm3 = vcmask 31744   ;;  %v221_v5 = vrot.slane %v4064_v2, 1 }
  0x4b   :  { %3331 = vmatprep.subr.mxu1 %v3956_v0  ;;  %3333 = vmatprep.mubr.msk.f32.mxu1 %vm3957_vm0, %v3956_v0  ;;  %v141_v4 = vrot.slane %v4069_v3, 7  ;;  %v295_v8 = vrot.slane %v4064_v2, 2  ;;  %v296_v9 = vrot.slane %v4069_v3, 1  ;;  %v445_v11 = vrot.slane %v4064_v2, 4  ;;  %v4116_v17 = vld [vmem:[#allocation2 + $0x18] sm:$0xff]  ;;  %v4119_v18 = vld [vmem:[#allocation2 + $0x10] sm:$0xff] }
  0x4c   :  { %3317 = vmatpush3.msk.msra.mxu0 %vm147_vm1, %v4059_v1  ;;  %3332 = vmatpush3.msk.msra.mxu1 %vm147_vm1, %v4059_v1  ;;  %v222_v7 = vsel %vm142_vm2, %v4069_v3, %v221_v5  ;;  %v446_v12 = vrot.slane %v4069_v3, 3  ;;  %v595_v14 = vrot.slane %v4064_v2, 6  ;;  %v596_v15 = vrot.slane %v4069_v3, 5  ;;  %v4125_v19 = vld [vmem:[#allocation2 + $0x8] sm:$0xff]  ;;  %v4129_v20 = vld [vmem:[#allocation2] sm:$0xff]  ;;  %s3958_s13 = smov 64  }
  0x4d   :  { %3321 = vmatprep.subr.mxu0 %v3956_v0  ;;  %3341 = vmatprep.subr.mxu1 %v3956_v0  ;;  %v143_v6 = vsel %vm142_vm2, %v141_v4, %v4064_v2  ;;  %v297_v10 = vsel %vm142_vm2, %v296_v9, %v295_v8  ;;  %v4157_v31 = vld [vmem:[%s4634_s3] ss:$0 sm:$0xff]  ;;  %s3959_s14 = smov 32   ;;  %v370_v46 = vrot.slane %v4064_v2, 3  ;;  %v371_v47 = vrot.slane %v4069_v3, 2  ;;  %v4189_v55 = vld [vmem:[%s4635_s4 + $0x18] sm:$0xff] }
  0x4e   :  { %3319 = vmatmul.mubr.msk.f32.vlgmr.msra.gmra.mxu0 %vm144_vm3, %v143_v6  ;;  %v447_v13 = vsel %vm142_vm2, %v446_v12, %v445_v11  ;;  %v597_v16 = vsel %vm142_vm2, %v596_v15, %v595_v14  ;;  %v520_v48 = vrot.slane %v4064_v2, 5  ;;  %v521_v49 = vrot.slane %v4069_v3, 4  ;;  %v4196_v57 = vld [vmem:[%s4635_s4 + $0x10] sm:$0xff]  ;;  %v4205_v58 = vld [vmem:[%s4635_s4 + $0x8] sm:$0xff]  ;;  %v4212_v59 = vld [vmem:[%s4635_s4] sm:$0xff] }
  0x4f   :  { %3322 = vmatpush3.msk.msra.mxu0 %vm147_vm1, %v4059_v1  ;;  %3323 = vmatprep.mubr.msk.f32.mxu0 %vm3957_vm0, %v3956_v0  ;;  %v372_v50 = vsel %vm142_vm2, %v371_v47, %v370_v46  ;;  %v670_v52 = vrot.slane %v4064_v2, 7  ;;  %v671_v53 = vrot.slane %v4069_v3, 6  ;;  %vm745_vm4 = vcmask 261120   ;;  %v4225_v5 = vld [vmem:[#allocation4 + $0x18] sm:$0xff]  ;;  %v4235_v8 = vld [vmem:[#allocation4 + $0x8] sm:$0xff]  ;;  %v4241_v9 = vld [vmem:[#allocation4] sm:$0xff] }
  0x50   :  { %3326 = vmatprep.subr.mxu0 %v3956_v0  ;;  %3334 = vmatmul.mubr.msk.f32.vlgmr.msra.gmra.mxu1 %vm144_vm3, %v372_v50  ;;  %v522_v51 = vsel %vm142_vm2, %v521_v49, %v520_v48 }
  0x51   :  { %3342 = vmatpush3.msk.msra.mxu1 %vm147_vm1, %v4059_v1  ;;  %3343 = vmatprep.mubr.msk.f32.mxu1 %vm3957_vm0, %v3956_v0  ;;  %v672_v54 = vsel %vm142_vm2, %v671_v53, %v670_v52 }
  0x52   :  { %3324 = vmatmul.mubr.msk.f32.vlgmr.msra.gmra.mxu0 %vm144_vm3, %v222_v7  ;;  %3351 = vmatprep.subr.mxu1 %v3956_v0  ;;  %v4229_v7 = vld [vmem:[#allocation4 + $0x10] sm:$0xff] }
  0x53   :  { %3327 = vmatpush3.msk.msra.mxu0 %vm147_vm1, %v4059_v1  ;;  %3328 = vmatprep.mubr.msk.f32.mxu0 %vm3957_vm0, %v3956_v0 }
  0x54   :  { %3336 = vmatprep.subr.mxu0 %v3956_v0  ;;  %3344 = vmatmul.mubr.msk.f32.vlgmr.msra.gmra.mxu1 %vm144_vm3, %v522_v51 }
  0x55   :  { %3352 = vmatpush3.msk.msra.mxu1 %vm147_vm1, %v4059_v1  ;;  %3353 = vmatprep.mubr.msk.f32.mxu1 %vm3957_vm0, %v3956_v0 }
  0x56   :  { %3329 = vmatmul.mubr.msk.f32.vlgmr.msra.gmra.mxu0 %vm144_vm3, %v297_v10  ;;  %3389 = vmatprep.subr.mxu1 %v3956_v0 }
  0x57   :  { %3337 = vmatpush3.msk.msra.mxu0 %vm147_vm1, %v4059_v1  ;;  %3338 = vmatprep.mubr.msk.f32.mxu0 %vm3957_vm0, %v3956_v0 }
  0x58   :  { %3346 = vmatprep.subr.mxu0 %v3956_v0  ;;  %3354 = vmatmul.mubr.msk.f32.vlgmr.msra.gmra.mxu1 %vm144_vm3, %v672_v54 }
  0x59   :  { %3390 = vmatpush3.msra.mxu1 %v4189_v55  ;;  %3397 = vmatprep.mubr.msk.f32.mxu1 %vm3957_vm0, %v3956_v0 }
  0x5a   :  { %3339 = vmatmul.mubr.msk.f32.vlgmr.msra.gmra.mxu0 %vm144_vm3, %v447_v13  ;;  %3391 = vmatprep.subr.mxu1 %v3956_v0 }
  0x5b   :  { %3347 = vmatpush3.msk.msra.mxu0 %vm147_vm1, %v4059_v1  ;;  %3348 = vmatprep.mubr.msk.f32.mxu0 %vm3957_vm0, %v3956_v0 }
  0x5c   :  { %3356 = vmatprep.subr.mxu0 %v3956_v0  ;;  %3392 = vmatpush3.msra.mxu1 %v4196_v57 }
  0x5d   :  { %3393 = vmatprep.subr.mxu1 %v3956_v0 }
  0x5e   :  { %3349 = vmatmul.mubr.msk.f32.vlgmr.msra.gmra.mxu0 %vm144_vm3, %v597_v16  ;;  %3394 = vmatpush3.msra.mxu1 %v4205_v58  ;;  %v4271_v16 = vld [vmem:[%s4637_s6] ss:$0 sm:$0xff] }
  0x5f   :  { %3357 = vmatpush3.msra.mxu0 %v4116_v17  ;;  %3364 = vmatprep.mubr.msk.f32.mxu0 %vm3957_vm0, %v3956_v0 }
  0x60   :  { %3358 = vmatprep.subr.mxu0 %v3956_v0  ;;  %3395 = vmatprep.subr.mxu1 %v3956_v0 }
  0x61   :  { %3359 = vmatpush3.msra.mxu0 %v4119_v18  ;;  %3396 = vmatpush3.msra.mxu1 %v4212_v59 }
  0x62   :  { %3360 = vmatprep.subr.mxu0 %v3956_v0  ;;  %3411 = vmatprep.subr.mxu1 %v3956_v0 }
  0x63   :  { %3361 = vmatpush3.msra.mxu0 %v4125_v19 }
  0x64   :  { %3362 = vmatprep.subr.mxu0 %v3956_v0 }
  0x65   :  { %3363 = vmatpush3.msra.mxu0 %v4129_v20 }
  0x66   :  { %3365 = vmatmul.mubr.f32.vlgmr.msra.gmra.mxu0 %v3956_v0  ;;  %3367 = vmatprep.subr.mxu0 %v3956_v0 }
  0x67   :  { %3368 = vmatpush3.msra.mxu0 %v4116_v17  ;;  %3375 = vmatprep.mubr.msk.f32.mxu0 %vm3957_vm0, %v3956_v0 }
  0x68   :  { %3369 = vmatprep.subr.mxu0 %v3956_v0 }
  0x69   :  { %3370 = vmatpush3.msra.mxu0 %v4119_v18 }
  0x6a   :  { %3371 = vmatprep.subr.mxu0 %v3956_v0 }
  0x6b   :  { %3372 = vmatpush3.msra.mxu0 %v4125_v19 }
  0x6c   :  { %3373 = vmatprep.subr.mxu0 %v3956_v0 }
  0x6d   :  { %3374 = vmatpush3.msra.mxu0 %v4129_v20 }
  0x6e   :  { %3378 = vmatprep.subr.mxu0 %v3956_v0 }
 0x10e   :  { %v217_v21 = vpop.f32.mrf.mxu0 }
 0x10f   :  { %v218_v32 = vadd.f32 %v4157_v31, %v217_v21 }
 0x110   :  { %v3320_v22 = vpop.f32.mrf.mxu0  ;;  %v4219_v62 = vpop.f32.mrf.mxu1 }
 0x112   :  { %v4146_v23 = vpop.f32.mrf.mxu0  ;;  %v3335_v63 = vpop.f32.mrf.mxu1 }
 0x113   :  { %v292_v10 = vadd.f32 %v4157_v31, %v4146_v23 }
 0x114   :  { %v3325_v24 = vpop.f32.mrf.mxu0  ;;  %v4221_v1 = vpop.f32.mrf.mxu1 }
 0x116   :  { %v4148_v25 = vpop.f32.mrf.mxu0  ;;  %v3345_v2 = vpop.f32.mrf.mxu1 }
 0x118   :  { %v3330_v26 = vpop.f32.mrf.mxu0  ;;  %v4223_v3 = vpop.f32.mrf.mxu1 }
 0x11a   :  { %v4150_v27 = vpop.f32.mrf.mxu0  ;;  %v3355_v4 = vpop.f32.mrf.mxu1 }
 0x11c   :  { %v3340_v28 = vpop.f32.mrf.mxu0 }
 0x11e   :  { %v4152_v29 = vpop.f32.mrf.mxu0 }
 0x120   :  { %v3350_v30 = vpop.f32.mrf.mxu0 }
 0x126   :  { %v815_v33 = vpop.f32.mrf.mxu0 }
 0x127   :  { %v819_v34 = vadd.f32 %v815_v33, %v218_v32 }
 0x128   :  { %v3366_v35 = vpop.f32.mrf.mxu0 }
 0x129   :  { %3678 = vtanh.f32 %v819_v34  ;;  %v3116_v37 = vmul.f32 -1.442695, %v819_v34 }
 0x12b   :  { %3680 = vpow2.f32 %v3116_v37 }
 0x136   :  { %v3679_v36 = vpop.eup %3678 }
 0x137   :  { %829 = vrot.lane.b32.xlu0 %v3679_v36, %s3958_s13 }
 0x138   :  { %v3681_v38 = vpop.eup %3680 }
 0x139   :  { %v823_v39 = vadd.f32 1.0, %v3681_v38 }
 0x13b   :  { %3682 = vrcp.f32 %v823_v39 }
 0x148   :  { %v3683_v40 = vpop.eup %3682 }
 0x149   :  { %v827_v43 = vmul.f32 0.0, %v3683_v40 }
 0x1a9   :  { %v830_v41 = vpop.permute.xlu0 %829 }
 0x1aa   :  { %v832_v42 = vmul.f32 %v3683_v40, %v830_v41 }
 0x1ac   :  { %834 = vrot.lane.b32.xlu0 %v832_v42, %s3959_s14 }
 0x21e   :  { %v835_v44 = vpop.permute.xlu0 %834 }
 0x21f   :  { %v4162_v45 = vadd.f32 %v835_v44, %v827_v43 }
 0x221   :  { %3684 = vtanh.f32 %v4162_v45 }
 0x22e   :  { %v3685_v56 = vpop.eup %3684 }
 0x22f   :  { %840 = vrot.lane.b32.xlu1 %v3685_v56, %s3958_s13 }
 0x2a1   :  { %v841_v60 = vpop.permute.xlu1 %840 }
 0x2a2   :  { %v843_v61 = vmul.f32 %v3683_v40, %v841_v60 }
 0x2a4   :  { %845 = vrot.lane.b32.xlu1 %v843_v61, %s3959_s14  ;;  %v367_v61 = vadd.f32 %v4157_v31, %v4148_v25 }
 0x316   :  { %v846_v6 = vpop.permute.xlu1 %845 }
 0x317   :  { %3376 = vmatmul.mubr.msk.f32.vlgmr.msra.gmra.mxu0 %vm745_vm4, %v846_v6  ;;  %3398 = vmatmul.mubr.msk.f32.vlgmr.msra.gmra.mxu1 %vm745_vm4, %v846_v6 }
 0x318   :  { %3379 = vmatpush3.msra.mxu0 %v4225_v5  ;;  %3386 = vmatprep.mubr.msk.f32.mxu0 %vm3957_vm0, %v3956_v0 }
 0x319   :  { %3380 = vmatprep.subr.mxu0 %v3956_v0  ;;  %3412 = vmatpush3.msra.mxu1 %v4225_v5 }
 0x31a   :  { %3381 = vmatpush3.msra.mxu0 %v4229_v7  ;;  %3413 = vmatprep.subr.mxu1 %v3956_v0 }
 0x31b   :  { %3382 = vmatprep.subr.mxu0 %v3956_v0  ;;  %3414 = vmatpush3.msra.mxu1 %v4229_v7 }
 0x31c   :  { %3383 = vmatpush3.msra.mxu0 %v4235_v8  ;;  %3415 = vmatprep.subr.mxu1 %v3956_v0 }
 0x31d   :  { %3384 = vmatprep.subr.mxu0 %v3956_v0  ;;  %3416 = vmatpush3.msra.mxu1 %v4235_v8 }
 0x31e   :  { %3385 = vmatpush3.msra.mxu0 %v4241_v9  ;;  %3417 = vmatprep.subr.mxu1 %v3956_v0 }
 0x31f   :  { %3387 = vmatmul.mubr.f32.vlgmr.msra.gmra.mxu0 %v3956_v0  ;;  %3400 = vmatprep.subr.mxu0 %v3956_v0 }
 0x320   :  { %3401 = vmatpush3.msra.mxu0 %v4116_v17  ;;  %3408 = vmatprep.mubr.msk.f32.mxu0 %vm3957_vm0, %v3956_v0 }
 0x321   :  { %3402 = vmatprep.subr.mxu0 %v3956_v0  ;;  %3418 = vmatpush3.msra.mxu1 %v4241_v9 }
 0x322   :  { %3403 = vmatpush3.msra.mxu0 %v4119_v18  ;;  %3419 = vmatprep.mubr.msk.f32.mxu1 %vm3957_vm0, %v3956_v0 }
 0x323   :  { %3404 = vmatprep.subr.mxu0 %v3956_v0  ;;  %3433 = vmatprep.subr.mxu1 %v3956_v0 }
 0x324   :  { %3405 = vmatpush3.msra.mxu0 %v4125_v19 }
 0x325   :  { %3406 = vmatprep.subr.mxu0 %v3956_v0 }
 0x326   :  { %3407 = vmatpush3.msra.mxu0 %v4129_v20 }
 0x327   :  { %3422 = vmatprep.subr.mxu0 %v3956_v0 }
 0x3d7   :  { %v915_v11 = vpop.f32.mrf.mxu0  ;;  %v1080_v12 = vpop.f32.mrf.mxu1 }
 0x3d8   :  { %v919_v13 = vadd.f32 %v915_v11, %v292_v10 }
 0x3d9   :  { %v3377_v14 = vpop.f32.mrf.mxu0  ;;  %v3399_v15 = vpop.f32.mrf.mxu1 }
 0x3da   :  { %3686 = vtanh.f32 %v919_v13  ;;  %v3118_v30 = vmul.f32 -1.442695, %v919_v13 }
 0x3df   :  { %v1010_v21 = vpop.f32.mrf.mxu0 }
 0x3e0   :  { %v1081_v22 = vadd.f32 %v1080_v12, %v1010_v21 }
 0x3e1   :  { %v3388_v24 = vpop.f32.mrf.mxu0 }
 0x3e2   :  { %v1090_v26 = vadd.f32 %v4271_v16, %v1081_v22 }
 0x3e4   :  { %3688 = vtanh.f32 %v1090_v26  ;;  %v3121_v32 = vmul.f32 -1.442695, %v1090_v26 }
 0x3e5   :  { %3690 = vpow2.f32 %v3118_v30 }
 0x3e6   :  { %3692 = vpow2.f32 %v3121_v32 }
 0x3e7   :  { %v3687_v28 = vpop.eup %3686 }
 0x3e8   :  { %929 = vrot.lane.b32.xlu0 %v3687_v28, %s3958_s13 }
 0x3f1   :  { %v3689_v23 = vpop.eup %3688 }
 0x3f2   :  { %1100 = vrot.lane.b32.xlu1 %v3689_v23, %s3958_s13  ;;  %v3691_v33 = vpop.eup %3690 }
 0x3f3   :  { %v923_v34 = vadd.f32 1.0, %v3691_v33  ;;  %v3693_v35 = vpop.eup %3692 }
 0x3f4   :  { %v1094_v36 = vadd.f32 1.0, %v3693_v35 }
 0x3f5   :  { %3694 = vrcp.f32 %v923_v34 }
 0x3f6   :  { %3696 = vrcp.f32 %v1094_v36 }
 0x402   :  { %v3695_v37 = vpop.eup %3694 }
 0x403   :  { %v3697_v40 = vpop.eup %3696  ;;  %v927_v43 = vmul.f32 %v3695_v37, %v4162_v45 }
 0x404   :  { %v1098_v47 = vmul.f32 0.0, %v3697_v40 }
 0x45a   :  { %v930_v38 = vpop.permute.xlu0 %929 }
 0x45b   :  { %v932_v39 = vmul.f32 %v3695_v37, %v930_v38 }
 0x45d   :  { %934 = vrot.lane.b32.xlu0 %v932_v39, %s3959_s14 }
 0x464   :  { %v1101_v41 = vpop.permute.xlu1 %1100 }
 0x465   :  { %v1103_v42 = vmul.f32 %v3697_v40, %v1101_v41 }
 0x467   :  { %1105 = vrot.lane.b32.xlu1 %v1103_v42, %s3959_s14 }
 0x4cf   :  { %v935_v44 = vpop.permute.xlu0 %934 }
 0x4d0   :  { %v4279_v46 = vadd.f32 %v935_v44, %v927_v43 }
 0x4d2   :  { %3698 = vtanh.f32 %v4279_v46 }
 0x4d9   :  { %v1106_v48 = vpop.permute.xlu1 %1105 }
 0x4da   :  { %v4282_v49 = vadd.f32 %v1106_v48, %v1098_v47 }
 0x4dc   :  { %3700 = vtanh.f32 %v4282_v49 }
 0x4df   :  { %v3699_v50 = vpop.eup %3698 }
 0x4e0   :  { %940 = vrot.lane.b32.xlu0 %v3699_v50, %s3958_s13 }
 0x4e9   :  { %v3701_v51 = vpop.eup %3700 }
 0x4ea   :  { %1111 = vrot.lane.b32.xlu1 %v3701_v51, %s3958_s13 }
 0x552   :  { %v941_v52 = vpop.permute.xlu0 %940 }
 0x553   :  { %v943_v53 = vmul.f32 %v3695_v37, %v941_v52  ;;  %v442_v52 = vadd.f32 %v4157_v31, %v4219_v62 }
 0x555   :  { %1116 = vrot.lane.b32.xlu0 %v943_v53, %s3959_s14 }
 0x55c   :  { %v1112_v45 = vpop.permute.xlu1 %1111 }
 0x55d   :  { %v1114_v54 = vmul.f32 %v3697_v40, %v1112_v45 }
 0x55f   :  { %1216 = vrot.lane.b32.xlu1 %v1114_v54, %s3959_s14 }
 0x5c7   :  { %v1117_v56 = vpop.permute.xlu0 %1116 }
 0x5c8   :  { %3409 = vmatmul.mubr.msk.f32.vlgmr.msra.gmra.mxu0 %vm745_vm4, %v1117_v56 }
 0x5c9   :  { %3423 = vmatpush3.msra.mxu0 %v4189_v55  ;;  %3430 = vmatprep.mubr.msk.f32.mxu0 %vm3957_vm0, %v3956_v0 }
 0x5ca   :  { %3424 = vmatprep.subr.mxu0 %v3956_v0 }
 0x5cb   :  { %3425 = vmatpush3.msra.mxu0 %v4196_v57 }
 0x5cc   :  { %3426 = vmatprep.subr.mxu0 %v3956_v0 }
 0x5cd   :  { %3427 = vmatpush3.msra.mxu0 %v4205_v58 }
 0x5ce   :  { %3428 = vmatprep.subr.mxu0 %v3956_v0 }
 0x5cf   :  { %3429 = vmatpush3.msra.mxu0 %v4212_v59 }
 0x5d0   :  { %3431 = vmatmul.mubr.msk.f32.vlgmr.msra.gmra.mxu0 %vm745_vm4, %v1117_v56  ;;  %3444 = vmatprep.subr.mxu0 %v3956_v0 }
 0x5d1   :  { %v1217_v60 = vpop.permute.xlu1 %1216  ;;  %3445 = vmatpush3.msra.mxu0 %v4225_v5  ;;  %3452 = vmatprep.mubr.msk.f32.mxu0 %vm3957_vm0, %v3956_v0 }
 0x5d2   :  { %3420 = vmatmul.mubr.msk.f32.vlgmr.msra.gmra.mxu1 %vm745_vm4, %v1217_v60  ;;  %3446 = vmatprep.subr.mxu0 %v3956_v0 }
 0x5d3   :  { %3434 = vmatpush3.msra.mxu1 %v4116_v17  ;;  %3441 = vmatprep.mubr.msk.f32.mxu1 %vm3957_vm0, %v3956_v0 }
 0x5d4   :  { %3435 = vmatprep.subr.mxu1 %v3956_v0  ;;  %3447 = vmatpush3.msra.mxu0 %v4229_v7 }
 0x5d5   :  { %3436 = vmatpush3.msra.mxu1 %v4119_v18  ;;  %3448 = vmatprep.subr.mxu0 %v3956_v0 }
 0x5d6   :  { %3437 = vmatprep.subr.mxu1 %v3956_v0  ;;  %3449 = vmatpush3.msra.mxu0 %v4235_v8 }
 0x5d7   :  { %3438 = vmatpush3.msra.mxu1 %v4125_v19  ;;  %3450 = vmatprep.subr.mxu0 %v3956_v0 }
 0x5d8   :  { %3439 = vmatprep.subr.mxu1 %v3956_v0  ;;  %3451 = vmatpush3.msra.mxu0 %v4241_v9 }
 0x5d9   :  { %3440 = vmatpush3.msra.mxu1 %v4129_v20  ;;  %3466 = vmatprep.subr.mxu0 %v3956_v0 }
 0x5da   :  { %3455 = vmatprep.subr.mxu1 %v3956_v0 }
 0x688   :  { %v1186_v63 = vpop.f32.mrf.mxu0 }
 0x689   :  { %v1190_v2 = vadd.f32 %v1186_v63, %v367_v61 }
 0x68a   :  { %v3410_v4 = vpop.f32.mrf.mxu0 }
 0x68b   :  { %3702 = vtanh.f32 %v1190_v2  ;;  %v3123_v22 = vmul.f32 -1.442695, %v1190_v2 }
 0x690   :  { %v1356_v6 = vpop.f32.mrf.mxu0 }
 0x692   :  { %v1286_v10 = vpop.f32.mrf.mxu1  ;;  %v3432_v11 = vpop.f32.mrf.mxu0 }
 0x693   :  { %v1357_v12 = vadd.f32 %v1356_v6, %v1286_v10 }
 0x694   :  { %v3421_v13 = vpop.f32.mrf.mxu1 }
 0x695   :  { %v1360_v14 = vadd.f32 %v4271_v16, %v1357_v12 }
 0x697   :  { %3704 = vtanh.f32 %v1360_v14  ;;  %v3126_v25 = vmul.f32 -1.442695, %v1360_v14 }
 0x698   :  { %v3703_v15 = vpop.eup %3702  ;;  %3706 = vpow2.f32 %v3123_v22 }
 0x699   :  { %1200 = vrot.lane.b32.xlu0 %v3703_v15, %s3958_s13  ;;  %3708 = vpow2.f32 %v3126_v25 }
 0x6a4   :  { %v3705_v21 = vpop.eup %3704 }
 0x6a5   :  { %1370 = vrot.lane.b32.xlu1 %v3705_v21, %s3958_s13  ;;  %v3707_v24 = vpop.eup %3706 }
 0x6a6   :  { %v1194_v26 = vadd.f32 1.0, %v3707_v24  ;;  %v3709_v28 = vpop.eup %3708 }
 0x6a7   :  { %v1364_v23 = vadd.f32 1.0, %v3709_v28 }
 0x6a8   :  { %3710 = vrcp.f32 %v1194_v26 }
 0x6a9   :  { %3712 = vrcp.f32 %v1364_v23 }
 0x6b5   :  { %v3711_v30 = vpop.eup %3710 }
 0x6b6   :  { %v3713_v34 = vpop.eup %3712  ;;  %v1198_v37 = vmul.f32 %v3711_v30, %v4279_v46 }
 0x6b7   :  { %v1368_v40 = vmul.f32 %v3713_v34, %v4282_v49 }
 0x70b   :  { %v1201_v32 = vpop.permute.xlu0 %1200 }
 0x70c   :  { %v1203_v33 = vmul.f32 %v3711_v30, %v1201_v32 }
 0x70e   :  { %1205 = vrot.lane.b32.xlu0 %v1203_v33, %s3959_s14 }
 0x717   :  { %v1371_v35 = vpop.permute.xlu1 %1370 }
 0x718   :  { %v1373_v36 = vmul.f32 %v3713_v34, %v1371_v35 }
 0x71a   :  { %1375 = vrot.lane.b32.xlu1 %v1373_v36, %s3959_s14 }
 0x780   :  { %v1206_v38 = vpop.permute.xlu0 %1205 }
 0x781   :  { %v4330_v39 = vadd.f32 %v1206_v38, %v1198_v37 }
 0x783   :  { %3714 = vtanh.f32 %v4330_v39 }
 0x78c   :  { %v1376_v41 = vpop.permute.xlu1 %1375 }
 0x78d   :  { %v4334_v42 = vadd.f32 %v1376_v41, %v1368_v40 }
 0x78f   :  { %3716 = vtanh.f32 %v4334_v42 }
 0x790   :  { %v3715_v43 = vpop.eup %3714 }
 0x791   :  { %1211 = vrot.lane.b32.xlu0 %v3715_v43, %s3958_s13 }
 0x79c   :  { %v3717_v44 = vpop.eup %3716 }
 0x79d   :  { %1381 = vrot.lane.b32.xlu1 %v3717_v44, %s3958_s13  ;;  %v517_v44 = vadd.f32 %v4157_v31, %v4150_v27 }
 0x803   :  { %v1212_v47 = vpop.permute.xlu0 %1211 }
 0x804   :  { %v1214_v46 = vmul.f32 %v3711_v30, %v1212_v47 }
 0x806   :  { %1386 = vrot.lane.b32.xlu0 %v1214_v46, %s3959_s14 }
 0x80f   :  { %v1382_v48 = vpop.permute.xlu1 %1381 }
 0x810   :  { %v1384_v50 = vmul.f32 %v3713_v34, %v1382_v48 }
 0x812   :  { %1486 = vrot.lane.b32.xlu1 %v1384_v50, %s3959_s14 }
 0x878   :  { %v1387_v49 = vpop.permute.xlu0 %1386 }
 0x879   :  { %3442 = vmatmul.mubr.msk.f32.vlgmr.msra.gmra.mxu1 %vm745_vm4, %v1387_v49 }
 0x87a   :  { %3456 = vmatpush3.msra.mxu1 %v4189_v55  ;;  %3463 = vmatprep.mubr.msk.f32.mxu1 %vm3957_vm0, %v3956_v0 }
 0x87b   :  { %3457 = vmatprep.subr.mxu1 %v3956_v0 }
 0x87c   :  { %3458 = vmatpush3.msra.mxu1 %v4196_v57 }
 0x87d   :  { %3459 = vmatprep.subr.mxu1 %v3956_v0 }
 0x87e   :  { %3460 = vmatpush3.msra.mxu1 %v4205_v58 }
 0x87f   :  { %3461 = vmatprep.subr.mxu1 %v3956_v0 }
 0x880   :  { %3462 = vmatpush3.msra.mxu1 %v4212_v59 }
 0x881   :  { %3464 = vmatmul.mubr.msk.f32.vlgmr.msra.gmra.mxu1 %vm745_vm4, %v1387_v49  ;;  %3477 = vmatprep.subr.mxu1 %v3956_v0 }
 0x882   :  { %3478 = vmatpush3.msra.mxu1 %v4225_v5  ;;  %3485 = vmatprep.mubr.msk.f32.mxu1 %vm3957_vm0, %v3956_v0 }
 0x883   :  { %3479 = vmatprep.subr.mxu1 %v3956_v0 }
 0x884   :  { %v1487_v51 = vpop.permute.xlu1 %1486  ;;  %3480 = vmatpush3.msra.mxu1 %v4229_v7 }
 0x885   :  { %3453 = vmatmul.mubr.msk.f32.vlgmr.msra.gmra.mxu0 %vm745_vm4, %v1487_v51  ;;  %3481 = vmatprep.subr.mxu1 %v3956_v0 }
 0x886   :  { %3467 = vmatpush3.msra.mxu0 %v4116_v17  ;;  %3474 = vmatprep.mubr.msk.f32.mxu0 %vm3957_vm0, %v3956_v0 }
 0x887   :  { %3468 = vmatprep.subr.mxu0 %v3956_v0  ;;  %3482 = vmatpush3.msra.mxu1 %v4235_v8 }
 0x888   :  { %3469 = vmatpush3.msra.mxu0 %v4119_v18  ;;  %3483 = vmatprep.subr.mxu1 %v3956_v0 }
 0x889   :  { %3470 = vmatprep.subr.mxu0 %v3956_v0  ;;  %3484 = vmatpush3.msra.mxu1 %v4241_v9 }
 0x88a   :  { %3471 = vmatpush3.msra.mxu0 %v4125_v19  ;;  %3499 = vmatprep.subr.mxu1 %v3956_v0 }
 0x88b   :  { %3472 = vmatprep.subr.mxu0 %v3956_v0 }
 0x88c   :  { %3473 = vmatpush3.msra.mxu0 %v4129_v20 }
 0x88d   :  { %3488 = vmatprep.subr.mxu0 %v3956_v0 }
 0x939   :  { %v1456_v53 = vpop.f32.mrf.mxu1 }
 0x93a   :  { %v1460_v45 = vadd.f32 %v1456_v53, %v442_v52 }
 0x93b   :  { %v3443_v54 = vpop.f32.mrf.mxu1 }
 0x93c   :  { %3718 = vtanh.f32 %v1460_v45  ;;  %v3128_v11 = vmul.f32 -1.442695, %v1460_v45 }
 0x941   :  { %v1626_v56 = vpop.f32.mrf.mxu1 }
 0x943   :  { %v3465_v60 = vpop.f32.mrf.mxu1 }
 0x945   :  { %v1556_v61 = vpop.f32.mrf.mxu0 }
 0x946   :  { %v1627_v63 = vadd.f32 %v1626_v56, %v1556_v61 }
 0x947   :  { %v3454_v2 = vpop.f32.mrf.mxu0 }
 0x948   :  { %v1630_v4 = vadd.f32 %v4271_v16, %v1627_v63 }
 0x949   :  { %v3719_v6 = vpop.eup %3718 }
 0x94a   :  { %3720 = vtanh.f32 %v1630_v4  ;;  %1470 = vrot.lane.b32.xlu0 %v3719_v6, %s3958_s13  ;;  %v3131_v62 = vmul.f32 -1.442695, %v1630_v4 }
 0x94b   :  { %3722 = vpow2.f32 %v3128_v11 }
 0x94c   :  { %3724 = vpow2.f32 %v3131_v62 }
 0x957   :  { %v3721_v10 = vpop.eup %3720 }
 0x958   :  { %1640 = vrot.lane.b32.xlu1 %v3721_v10, %s3958_s13  ;;  %v3723_v12 = vpop.eup %3722 }
 0x959   :  { %v1464_v13 = vadd.f32 1.0, %v3723_v12  ;;  %v3725_v14 = vpop.eup %3724 }
 0x95a   :  { %v1634_v15 = vadd.f32 1.0, %v3725_v14 }
 0x95b   :  { %3726 = vrcp.f32 %v1464_v13 }
 0x95c   :  { %3728 = vrcp.f32 %v1634_v15 }
 0x968   :  { %v3727_v21 = vpop.eup %3726 }
 0x969   :  { %v3729_v24 = vpop.eup %3728  ;;  %v1468_v23 = vmul.f32 %v3727_v21, %v4330_v39 }
 0x96a   :  { %v1638_v33 = vmul.f32 %v3729_v24, %v4334_v42 }
 0x9bc   :  { %v1471_v22 = vpop.permute.xlu0 %1470 }
 0x9bd   :  { %v1473_v25 = vmul.f32 %v3727_v21, %v1471_v22 }
 0x9bf   :  { %1475 = vrot.lane.b32.xlu0 %v1473_v25, %s3959_s14 }
 0x9ca   :  { %v1641_v26 = vpop.permute.xlu1 %1640 }
 0x9cb   :  { %v1643_v28 = vmul.f32 %v3729_v24, %v1641_v26 }
 0x9cd   :  { %1645 = vrot.lane.b32.xlu1 %v1643_v28, %s3959_s14 }
 0xa31   :  { %v1476_v30 = vpop.permute.xlu0 %1475 }
 0xa32   :  { %v4382_v32 = vadd.f32 %v1476_v30, %v1468_v23 }
 0xa34   :  { %3730 = vtanh.f32 %v4382_v32 }
 0xa3f   :  { %v1646_v34 = vpop.permute.xlu1 %1645 }
 0xa40   :  { %v4386_v35 = vadd.f32 %v1646_v34, %v1638_v33 }
 0xa41   :  { %v3731_v36 = vpop.eup %3730 }
 0xa42   :  { %3732 = vtanh.f32 %v4386_v35  ;;  %1481 = vrot.lane.b32.xlu0 %v3731_v36, %s3958_s13 }
 0xa4f   :  { %v3733_v37 = vpop.eup %3732 }
 0xa50   :  { %1651 = vrot.lane.b32.xlu1 %v3733_v37, %s3958_s13 }
 0xab4   :  { %v1482_v38 = vpop.permute.xlu0 %1481 }
 0xab5   :  { %v1484_v39 = vmul.f32 %v3727_v21, %v1482_v38 }
 0xab7   :  { %1656 = vrot.lane.b32.xlu0 %v1484_v39, %s3959_s14 }
 0xac2   :  { %v1652_v40 = vpop.permute.xlu1 %1651 }
 0xac3   :  { %v1654_v41 = vmul.f32 %v3729_v24, %v1652_v40 }
 0xac5   :  { %1756 = vrot.lane.b32.xlu1 %v1654_v41, %s3959_s14 }
 0xb29   :  { %v1657_v42 = vpop.permute.xlu0 %1656 }
 0xb2a   :  { %3475 = vmatmul.mubr.msk.f32.vlgmr.msra.gmra.mxu0 %vm745_vm4, %v1657_v42 }
 0xb2b   :  { %3489 = vmatpush3.msra.mxu0 %v4189_v55  ;;  %3496 = vmatprep.mubr.msk.f32.mxu0 %vm3957_vm0, %v3956_v0 }
 0xb2c   :  { %3490 = vmatprep.subr.mxu0 %v3956_v0 }
 0xb2d   :  { %3491 = vmatpush3.msra.mxu0 %v4196_v57 }
 0xb2e   :  { %3492 = vmatprep.subr.mxu0 %v3956_v0 }
 0xb2f   :  { %3493 = vmatpush3.msra.mxu0 %v4205_v58 }
 0xb30   :  { %3494 = vmatprep.subr.mxu0 %v3956_v0 }
 0xb31   :  { %3495 = vmatpush3.msra.mxu0 %v4212_v59 }
 0xb32   :  { %3497 = vmatmul.mubr.msk.f32.vlgmr.msra.gmra.mxu0 %vm745_vm4, %v1657_v42  ;;  %3510 = vmatprep.subr.mxu0 %v3956_v0 }
 0xb33   :  { %3511 = vmatpush3.msra.mxu0 %v4225_v5  ;;  %3518 = vmatprep.mubr.msk.f32.mxu0 %vm3957_vm0, %v3956_v0 }
 0xb34   :  { %3512 = vmatprep.subr.mxu0 %v3956_v0 }
 0xb35   :  { %3513 = vmatpush3.msra.mxu0 %v4229_v7 }
 0xb36   :  { %3514 = vmatprep.subr.mxu0 %v3956_v0 }
 0xb37   :  { %v1757_v43 = vpop.permute.xlu1 %1756  ;;  %3515 = vmatpush3.msra.mxu0 %v4235_v8 }
 0xb38   :  { %3486 = vmatmul.mubr.msk.f32.vlgmr.msra.gmra.mxu1 %vm745_vm4, %v1757_v43  ;;  %3516 = vmatprep.subr.mxu0 %v3956_v0 }
 0xb39   :  { %3500 = vmatpush3.msra.mxu1 %v4116_v17  ;;  %3507 = vmatprep.mubr.msk.f32.mxu1 %vm3957_vm0, %v3956_v0 }
 0xb3a   :  { %3501 = vmatprep.subr.mxu1 %v3956_v0  ;;  %3517 = vmatpush3.msra.mxu0 %v4241_v9 }
 0xb3b   :  { %3502 = vmatpush3.msra.mxu1 %v4119_v18  ;;  %3532 = vmatprep.subr.mxu0 %v3956_v0 }
 0xb3c   :  { %3503 = vmatprep.subr.mxu1 %v3956_v0 }
 0xb3d   :  { %3504 = vmatpush3.msra.mxu1 %v4125_v19 }
 0xb3e   :  { %3505 = vmatprep.subr.mxu1 %v3956_v0 }
 0xb3f   :  { %3506 = vmatpush3.msra.mxu1 %v4129_v20 }
 0xb40   :  { %3521 = vmatprep.subr.mxu1 %v3956_v0 }
 0xbea   :  { %v1726_v47 = vpop.f32.mrf.mxu0 }
 0xbeb   :  { %v1730_v46 = vadd.f32 %v1726_v47, %v517_v44 }
 0xbec   :  { %v3476_v48 = vpop.f32.mrf.mxu0 }
 0xbed   :  { %3734 = vtanh.f32 %v1730_v46  ;;  %v3133_v60 = vmul.f32 -1.442695, %v1730_v46 }
 0xbf2   :  { %v1896_v50 = vpop.f32.mrf.mxu0 }
 0xbf4   :  { %v3498_v49 = vpop.f32.mrf.mxu0 }
 0xbf8   :  { %v1826_v51 = vpop.f32.mrf.mxu1 }
 0xbf9   :  { %v1897_v52 = vadd.f32 %v1896_v50, %v1826_v51 }
 0xbfa   :  { %v3735_v53 = vpop.eup %3734  ;;  %v3487_v45 = vpop.f32.mrf.mxu1 }
 0xbfb   :  { %v1900_v54 = vadd.f32 %v4271_v16, %v1897_v52  ;;  %1740 = vrot.lane.b32.xlu0 %v3735_v53, %s3958_s13 }
 0xbfd   :  { %3736 = vtanh.f32 %v1900_v54  ;;  %v3136_v27 = vmul.f32 -1.442695, %v1900_v54 }
 0xbfe   :  { %3738 = vpow2.f32 %v3133_v60 }
 0xbff   :  { %3740 = vpow2.f32 %v3136_v27 }
 0xc0a   :  { %v3737_v56 = vpop.eup %3736 }
 0xc0b   :  { %1910 = vrot.lane.b32.xlu1 %v3737_v56, %s3958_s13  ;;  %v3739_v61 = vpop.eup %3738 }
 0xc0c   :  { %v1734_v63 = vadd.f32 1.0, %v3739_v61  ;;  %v3741_v2 = vpop.eup %3740 }
 0xc0d   :  { %v1904_v4 = vadd.f32 1.0, %v3741_v2 }
 0xc0e   :  { %3742 = vrcp.f32 %v1734_v63 }
 0xc0f   :  { %3744 = vrcp.f32 %v1904_v4 }
 0xc1b   :  { %v3743_v6 = vpop.eup %3742 }
 0xc1c   :  { %v3745_v62 = vpop.eup %3744  ;;  %v1738_v14 = vmul.f32 %v3743_v6, %v4382_v32 }
 0xc1d   :  { %v1908_v22 = vmul.f32 %v3745_v62, %v4386_v35 }
 0xc6d   :  { %v1741_v10 = vpop.permute.xlu0 %1740 }
 0xc6e   :  { %v1743_v11 = vmul.f32 %v3743_v6, %v1741_v10 }
 0xc70   :  { %1745 = vrot.lane.b32.xlu0 %v1743_v11, %s3959_s14 }
 0xc7d   :  { %v1911_v12 = vpop.permute.xlu1 %1910 }
 0xc7e   :  { %v1913_v13 = vmul.f32 %v3745_v62, %v1911_v12 }
 0xc80   :  { %1915 = vrot.lane.b32.xlu1 %v1913_v13, %s3959_s14 }
 0xce2   :  { %v1746_v15 = vpop.permute.xlu0 %1745 }
 0xce3   :  { %v4434_v21 = vadd.f32 %v1746_v15, %v1738_v14 }
 0xce5   :  { %3746 = vtanh.f32 %v4434_v21 }
 0xcf2   :  { %v3747_v25 = vpop.eup %3746  ;;  %v1916_v24 = vpop.permute.xlu1 %1915 }
 0xcf3   :  { %v4438_v26 = vadd.f32 %v1916_v24, %v1908_v22  ;;  %1751 = vrot.lane.b32.xlu0 %v3747_v25, %s3958_s13 }
 0xcf5   :  { %3748 = vtanh.f32 %v4438_v26 }
 0xd02   :  { %v3749_v28 = vpop.eup %3748 }
 0xd03   :  { %1921 = vrot.lane.b32.xlu1 %v3749_v28, %s3958_s13 }
 0xd65   :  { %v1752_v23 = vpop.permute.xlu0 %1751 }
 0xd66   :  { %v1754_v30 = vmul.f32 %v3743_v6, %v1752_v23 }
 0xd68   :  { %1926 = vrot.lane.b32.xlu0 %v1754_v30, %s3959_s14 }
 0xd75   :  { %v1922_v32 = vpop.permute.xlu1 %1921 }
 0xd76   :  { %v1924_v33 = vmul.f32 %v3745_v62, %v1922_v32 }
 0xd78   :  { %2026 = vrot.lane.b32.xlu1 %v1924_v33, %s3959_s14 }
 0xdda   :  { %v1927_v34 = vpop.permute.xlu0 %1926 }
 0xddb   :  { %3508 = vmatmul.mubr.msk.f32.vlgmr.msra.gmra.mxu1 %vm745_vm4, %v1927_v34 }
 0xddc   :  { %3522 = vmatpush3.msra.mxu1 %v4189_v55  ;;  %3529 = vmatprep.mubr.msk.f32.mxu1 %vm3957_vm0, %v3956_v0 }
 0xddd   :  { %3523 = vmatprep.subr.mxu1 %v3956_v0 }
 0xdde   :  { %3524 = vmatpush3.msra.mxu1 %v4196_v57 }
 0xddf   :  { %3525 = vmatprep.subr.mxu1 %v3956_v0 }
 0xde0   :  { %3526 = vmatpush3.msra.mxu1 %v4205_v58 }
 0xde1   :  { %3527 = vmatprep.subr.mxu1 %v3956_v0 }
 0xde2   :  { %3528 = vmatpush3.msra.mxu1 %v4212_v59 }
 0xde3   :  { %3530 = vmatmul.mubr.msk.f32.vlgmr.msra.gmra.mxu1 %vm745_vm4, %v1927_v34  ;;  %3543 = vmatprep.subr.mxu1 %v3956_v0 }
 0xde4   :  { %3544 = vmatpush3.msra.mxu1 %v4225_v5  ;;  %3551 = vmatprep.mubr.msk.f32.mxu1 %vm3957_vm0, %v3956_v0 }
 0xde5   :  { %3545 = vmatprep.subr.mxu1 %v3956_v0 }
 0xde6   :  { %3546 = vmatpush3.msra.mxu1 %v4229_v7 }
 0xde7   :  { %3547 = vmatprep.subr.mxu1 %v3956_v0 }
 0xde8   :  { %3548 = vmatpush3.msra.mxu1 %v4235_v8 }
 0xde9   :  { %3549 = vmatprep.subr.mxu1 %v3956_v0 }
 0xdea   :  { %v2027_v35 = vpop.permute.xlu1 %2026  ;;  %3550 = vmatpush3.msra.mxu1 %v4241_v9 }
 0xdeb   :  { %3519 = vmatmul.mubr.msk.f32.vlgmr.msra.gmra.mxu0 %vm745_vm4, %v2027_v35  ;;  %3565 = vmatprep.subr.mxu1 %v3956_v0 }
 0xdec   :  { %3533 = vmatpush3.msra.mxu0 %v4116_v17  ;;  %3540 = vmatprep.mubr.msk.f32.mxu0 %vm3957_vm0, %v3956_v0  ;;  %v592_v17 = vadd.f32 %v4157_v31, %v4221_v1 }
 0xded   :  { %3534 = vmatprep.subr.mxu0 %v3956_v0 }
 0xdee   :  { %3535 = vmatpush3.msra.mxu0 %v4119_v18 }
 0xdef   :  { %3536 = vmatprep.subr.mxu0 %v3956_v0 }
 0xdf0   :  { %3537 = vmatpush3.msra.mxu0 %v4125_v19 }
 0xdf1   :  { %3538 = vmatprep.subr.mxu0 %v3956_v0 }
 0xdf2   :  { %3539 = vmatpush3.msra.mxu0 %v4129_v20 }
 0xdf3   :  { %3554 = vmatprep.subr.mxu0 %v3956_v0 }
 0xe9b   :  { %v1996_v36 = vpop.f32.mrf.mxu1 }
 0xe9c   :  { %v2000_v37 = vadd.f32 %v1996_v36, %v592_v17 }
 0xe9d   :  { %v3509_v38 = vpop.f32.mrf.mxu1 }
 0xe9e   :  { %3750 = vtanh.f32 %v2000_v37  ;;  %v3138_v44 = vmul.f32 -1.442695, %v2000_v37 }
 0xea3   :  { %v2166_v39 = vpop.f32.mrf.mxu1 }
 0xea5   :  { %v3531_v40 = vpop.f32.mrf.mxu1 }
 0xeab   :  { %v3751_v18 = vpop.eup %3750  ;;  %v2096_v41 = vpop.f32.mrf.mxu0 }
 0xeac   :  { %v2167_v42 = vadd.f32 %v2166_v39, %v2096_v41  ;;  %2010 = vrot.lane.b32.xlu0 %v3751_v18, %s3958_s13 }
 0xead   :  { %v3520_v19 = vpop.f32.mrf.mxu0 }
 0xeae   :  { %v2170_v43 = vadd.f32 %v4271_v16, %v2167_v42 }
 0xeb0   :  { %3752 = vtanh.f32 %v2170_v43  ;;  %v3141_v1 = vmul.f32 -1.442695, %v2170_v43 }
 0xeb1   :  { %3754 = vpow2.f32 %v3138_v44 }
 0xeb2   :  { %3756 = vpow2.f32 %v3141_v1 }
 0xebd   :  { %v3753_v20 = vpop.eup %3752 }
 0xebe   :  { %2180 = vrot.lane.b32.xlu1 %v3753_v20, %s3958_s13  ;;  %v3755_v31 = vpop.eup %3754 }
 0xebf   :  { %v2004_v47 = vadd.f32 1.0, %v3755_v31  ;;  %v3757_v46 = vpop.eup %3756 }
 0xec0   :  { %v2174_v51 = vadd.f32 1.0, %v3757_v46 }
 0xec1   :  { %3758 = vrcp.f32 %v2004_v47 }
 0xec2   :  { %3760 = vrcp.f32 %v2174_v51  ;;  %v3812_v51 = vld [vmem:[%s4635_s4 + $0x10] sm:$0xff] }
 0xece   :  { %v3759_v48 = vpop.eup %3758 }
 0xecf   :  { %v3761_v52 = vpop.eup %3760  ;;  %v2008_v54 = vmul.f32 %v3759_v48, %v4434_v21 }
 0xed0   :  { %v2178_v61 = vmul.f32 %v3761_v52, %v4438_v26 }
 0xf1e   :  { %v2011_v50 = vpop.permute.xlu0 %2010 }
 0xf1f   :  { %v2013_v49 = vmul.f32 %v3759_v48, %v2011_v50 }
 0xf21   :  { %2015 = vrot.lane.b32.xlu0 %v2013_v49, %s3959_s14  ;;  %v3811_v49 = vld [vmem:[%s4635_s4 + $0x18] sm:$0xff] }
 0xf30   :  { %v2181_v53 = vpop.permute.xlu1 %2180 }
 0xf31   :  { %v2183_v45 = vmul.f32 %v3761_v52, %v2181_v53  ;;  %v3814_v53 = vld [vmem:[%s4635_s4] sm:$0xff] }
 0xf33   :  { %2185 = vrot.lane.b32.xlu1 %v2183_v45, %s3959_s14 }
 0xf93   :  { %v2016_v56 = vpop.permute.xlu0 %2015 }
 0xf94   :  { %v4486_v60 = vadd.f32 %v2016_v56, %v2008_v54  ;;  %v3815_v54 = vld [vmem:[#allocation4 + $0x18] sm:$0xff]  ;;  %v3816_v56 = vld [vmem:[#allocation4 + $0x10] sm:$0xff] }
 0xf96   :  { %3762 = vtanh.f32 %v4486_v60 }
 0xfa3   :  { %v3763_v27 = vpop.eup %3762 }
 0xfa4   :  { %2021 = vrot.lane.b32.xlu0 %v3763_v27, %s3958_s13  ;;  %v3818_v27 = vld [vmem:[#allocation4] sm:$0xff] }
 0xfa5   :  { %v2186_v63 = vpop.permute.xlu1 %2185 }
 0xfa6   :  { %v4491_v2 = vadd.f32 %v2186_v63, %v2178_v61 }
 0xfa8   :  { %3764 = vtanh.f32 %v4491_v2 }
 0xfb5   :  { %v3765_v4 = vpop.eup %3764 }
 0xfb6   :  { %2191 = vrot.lane.b32.xlu1 %v3765_v4, %s3958_s13 }
0x1016   :  { %v2022_v6 = vpop.permute.xlu0 %2021 }
0x1017   :  { %v2024_v10 = vmul.f32 %v3759_v48, %v2022_v6 }
0x1019   :  { %2196 = vrot.lane.b32.xlu0 %v2024_v10, %s3959_s14 }
0x1028   :  { %v2192_v11 = vpop.permute.xlu1 %2191 }
0x1029   :  { %v2194_v62 = vmul.f32 %v3761_v52, %v2192_v11  ;;  %v3813_v52 = vld [vmem:[%s4635_s4 + $0x8] sm:$0xff] }
0x102b   :  { %2296 = vrot.lane.b32.xlu1 %v2194_v62, %s3959_s14 }
0x108b   :  { %v2197_v12 = vpop.permute.xlu0 %2196 }
0x108c   :  { %3541 = vmatmul.mubr.msk.f32.vlgmr.msra.gmra.mxu0 %vm745_vm4, %v2197_v12 }
0x108d   :  { %3555 = vmatpush3.msra.mxu0 %v4189_v55  ;;  %3562 = vmatprep.mubr.msk.f32.mxu0 %vm3957_vm0, %v3956_v0 }
0x108e   :  { %3556 = vmatprep.subr.mxu0 %v3956_v0 }
0x108f   :  { %3557 = vmatpush3.msra.mxu0 %v4196_v57  ;;  %v3806_v57 = vld [vmem:[#allocation2 + $0x18] sm:$0xff] }
0x1090   :  { %3558 = vmatprep.subr.mxu0 %v3956_v0 }
0x1091   :  { %3559 = vmatpush3.msra.mxu0 %v4205_v58  ;;  %v3807_v58 = vld [vmem:[#allocation2 + $0x10] sm:$0xff] }
0x1092   :  { %3560 = vmatprep.subr.mxu0 %v3956_v0 }
0x1093   :  { %3561 = vmatpush3.msra.mxu0 %v4212_v59  ;;  %v3808_v59 = vld [vmem:[#allocation2 + $0x8] sm:$0xff] }
0x1094   :  { %3563 = vmatmul.mubr.msk.f32.vlgmr.msra.gmra.mxu0 %vm745_vm4, %v2197_v12  ;;  %3576 = vmatprep.subr.mxu0 %v3956_v0 }
0x1095   :  { %3577 = vmatpush3.msra.mxu0 %v4225_v5  ;;  %3584 = vmatprep.mubr.msk.f32.mxu0 %vm3957_vm0, %v3956_v0  ;;  %v3809_v5 = vld [vmem:[#allocation2] sm:$0xff] }
0x1096   :  { %3578 = vmatprep.subr.mxu0 %v3956_v0 }
0x1097   :  { %3579 = vmatpush3.msra.mxu0 %v4229_v7  ;;  %v4529_v7 = vld [vmem:[%s4634_s3] ss:$0 sm:$0xff] }
0x1098   :  { %3580 = vmatprep.subr.mxu0 %v3956_v0  ;;  %v742_v61 = vadd.f32 %v4529_v7, %v4223_v3 }
0x1099   :  { %3581 = vmatpush3.msra.mxu0 %v4235_v8  ;;  %v667_v8 = vadd.f32 %v4529_v7, %v4152_v29 }
0x109a   :  { %3582 = vmatprep.subr.mxu0 %v3956_v0 }
0x109b   :  { %3583 = vmatpush3.msra.mxu0 %v4241_v9 }
0x109c   :  { %3598 = vmatprep.subr.mxu0 %v3956_v0 }
0x109d   :  { %v2297_v55 = vpop.permute.xlu1 %2296 }
0x109e   :  { %3552 = vmatmul.mubr.msk.f32.vlgmr.msra.gmra.mxu1 %vm745_vm4, %v2297_v55 }
0x109f   :  { %3566 = vmatpush3.msra.mxu1 %v3806_v57  ;;  %3573 = vmatprep.mubr.msk.f32.mxu1 %vm3957_vm0, %v3956_v0 }
0x10a0   :  { %3567 = vmatprep.subr.mxu1 %v3956_v0 }
0x10a1   :  { %3568 = vmatpush3.msra.mxu1 %v3807_v58 }
0x10a2   :  { %3569 = vmatprep.subr.mxu1 %v3956_v0 }
0x10a3   :  { %3570 = vmatpush3.msra.mxu1 %v3808_v59 }
0x10a4   :  { %3571 = vmatprep.subr.mxu1 %v3956_v0 }
0x10a5   :  { %3572 = vmatpush3.msra.mxu1 %v3809_v5 }
0x10a6   :  { %3587 = vmatprep.subr.mxu1 %v3956_v0 }
0x114c   :  { %v2266_v9 = vpop.f32.mrf.mxu0 }
0x114d   :  { %v2270_v13 = vadd.f32 %v2266_v9, %v667_v8 }
0x114e   :  { %v3542_v14 = vpop.f32.mrf.mxu0 }
0x114f   :  { %3766 = vtanh.f32 %v2270_v13  ;;  %v3143_v30 = vmul.f32 -1.442695, %v2270_v13 }
0x1154   :  { %v2436_v15 = vpop.f32.mrf.mxu0 }
0x1156   :  { %v3564_v21 = vpop.f32.mrf.mxu0 }
0x115c   :  { %v3767_v22 = vpop.eup %3766 }
0x115d   :  { %2280 = vrot.lane.b32.xlu0 %v3767_v22, %s3958_s13 }
0x115e   :  { %v2366_v25 = vpop.f32.mrf.mxu1 }
0x115f   :  { %v2437_v24 = vadd.f32 %v2436_v15, %v2366_v25 }
0x1160   :  { %v3553_v26 = vpop.f32.mrf.mxu1 }
0x1161   :  { %v2440_v28 = vadd.f32 %v4271_v16, %v2437_v24 }
0x1163   :  { %3768 = vtanh.f32 %v2440_v28  ;;  %v3146_v33 = vmul.f32 -1.442695, %v2440_v28 }
0x1164   :  { %3770 = vpow2.f32 %v3143_v30 }
0x1170   :  { %v3769_v23 = vpop.eup %3768 }
0x1171   :  { %2450 = vrot.lane.b32.xlu1 %v3769_v23, %s3958_s13  ;;  %v3771_v29 = vpop.eup %3770 }
0x1172   :  { %v2274_v32 = vadd.f32 1.0, %v3771_v29 }
0x1174   :  { %3772 = vrcp.f32 %v2274_v32 }
0x1175   :  { %3774 = vpow2.f32 %v3146_v33 }
0x1181   :  { %v3773_v34 = vpop.eup %3772 }
0x1182   :  { %v3775_v17 = vpop.eup %3774  ;;  %v2278_v18 = vmul.f32 %v3773_v34, %v4486_v60  ;;  %v3817_v60 = vld [vmem:[#allocation4 + $0x8] sm:$0xff] }
0x1183   :  { %v2444_v37 = vadd.f32 1.0, %v3775_v17 }
0x1185   :  { %3776 = vrcp.f32 %v2444_v37 }
0x1192   :  { %v3777_v38 = vpop.eup %3776 }
0x1193   :  { %v2448_v43 = vmul.f32 %v3777_v38, %v4491_v2 }
0x11cf   :  { %v2281_v35 = vpop.permute.xlu0 %2280 }
0x11d0   :  { %v2283_v36 = vmul.f32 %v3773_v34, %v2281_v35 }
0x11d2   :  { %2285 = vrot.lane.b32.xlu0 %v2283_v36, %s3959_s14 }
0x11e3   :  { %v2451_v39 = vpop.permute.xlu1 %2450 }
0x11e4   :  { %v2453_v40 = vmul.f32 %v3777_v38, %v2451_v39 }
0x11e6   :  { %2455 = vrot.lane.b32.xlu1 %v2453_v40, %s3959_s14 }
0x1244   :  { %v2286_v41 = vpop.permute.xlu0 %2285 }
0x1245   :  { %v4539_v42 = vadd.f32 %v2286_v41, %v2278_v18 }
0x1247   :  { %3778 = vtanh.f32 %v4539_v42 }
0x1254   :  { %v3779_v19 = vpop.eup %3778 }
0x1255   :  { %2291 = vrot.lane.b32.xlu0 %v3779_v19, %s3958_s13 }
0x1258   :  { %v2456_v20 = vpop.permute.xlu1 %2455 }
0x1259   :  { %v4544_v44 = vadd.f32 %v2456_v20, %v2448_v43 }
0x125b   :  { %3780 = vtanh.f32 %v4544_v44 }
0x1268   :  { %v3781_v31 = vpop.eup %3780 }
0x1269   :  { %2461 = vrot.lane.b32.xlu1 %v3781_v31, %s3958_s13 }
0x12c7   :  { %v2292_v1 = vpop.permute.xlu0 %2291 }
0x12c8   :  { %v2294_v47 = vmul.f32 %v3773_v34, %v2292_v1 }
0x12ca   :  { %2466 = vrot.lane.b32.xlu0 %v2294_v47, %s3959_s14 }
0x12db   :  { %v2462_v46 = vpop.permute.xlu1 %2461 }
0x12dc   :  { %v2464_v48 = vmul.f32 %v3777_v38, %v2462_v46 }
0x12de   :  { %2566 = vrot.lane.b32.xlu1 %v2464_v48, %s3959_s14 }
0x133c   :  { %v2467_v50 = vpop.permute.xlu0 %2466 }
0x133d   :  { %3574 = vmatmul.mubr.msk.f32.vlgmr.msra.gmra.mxu1 %vm745_vm4, %v2467_v50 }
0x133e   :  { %3588 = vmatpush3.msra.mxu1 %v3811_v49  ;;  %3595 = vmatprep.mubr.msk.f32.mxu1 %vm3957_vm0, %v3956_v0 }
0x133f   :  { %3589 = vmatprep.subr.mxu1 %v3956_v0 }
0x1340   :  { %3590 = vmatpush3.msra.mxu1 %v3812_v51 }
0x1341   :  { %3591 = vmatprep.subr.mxu1 %v3956_v0 }
0x1342   :  { %3592 = vmatpush3.msra.mxu1 %v3813_v52 }
0x1343   :  { %3593 = vmatprep.subr.mxu1 %v3956_v0 }
0x1344   :  { %3594 = vmatpush3.msra.mxu1 %v3814_v53 }
0x1345   :  { %3596 = vmatmul.mubr.msk.f32.vlgmr.msra.gmra.mxu1 %vm745_vm4, %v2467_v50  ;;  %3609 = vmatprep.subr.mxu1 %v3956_v0 }
0x1346   :  { %3610 = vmatpush3.msra.mxu1 %v3811_v49  ;;  %3617 = vmatprep.mubr.msk.f32.mxu1 %vm3957_vm0, %v3956_v0 }
0x1347   :  { %3611 = vmatprep.subr.mxu1 %v3956_v0 }
0x1348   :  { %3612 = vmatpush3.msra.mxu1 %v3812_v51  ;;  %v2913_v51 = vld [vmem:[#allocation6 + $0x18] sm:$0xff] }
0x1349   :  { %3613 = vmatprep.subr.mxu1 %v3956_v0 }
0x134a   :  { %3614 = vmatpush3.msra.mxu1 %v3813_v52  ;;  %v2912_v52 = vld [vmem:[#allocation6 + $0x10] sm:$0xff] }
0x134b   :  { %3615 = vmatprep.subr.mxu1 %v3956_v0 }
0x134c   :  { %3616 = vmatpush3.msra.mxu1 %v3814_v53  ;;  %v2911_v53 = vld [vmem:[#allocation6 + $0x8] sm:$0xff] }
0x134d   :  { %3631 = vmatprep.subr.mxu1 %v3956_v0 }
0x1350   :  { %v2567_v45 = vpop.permute.xlu1 %2566 }
0x1351   :  { %3585 = vmatmul.mubr.msk.f32.vlgmr.msra.gmra.mxu0 %vm745_vm4, %v2567_v45  ;;  %v2910_v45 = vld [vmem:[#allocation6] sm:$0xff] }
0x1352   :  { %3599 = vmatpush3.msra.mxu0 %v3815_v54  ;;  %3606 = vmatprep.mubr.msk.f32.mxu0 %vm3957_vm0, %v3956_v0 }
0x1353   :  { %3600 = vmatprep.subr.mxu0 %v3956_v0 }
0x1354   :  { %3601 = vmatpush3.msra.mxu0 %v3816_v56  ;;  %v3012_v56 = vld [vmem:[#allocation9 + $0x78] sm:$0xff] }
0x1355   :  { %3602 = vmatprep.subr.mxu0 %v3956_v0 }
0x1356   :  { %3603 = vmatpush3.msra.mxu0 %v3817_v60  ;;  %v3011_v60 = vld [vmem:[#allocation9 + $0x70] sm:$0xff] }
0x1357   :  { %3604 = vmatprep.subr.mxu0 %v3956_v0 }
0x1358   :  { %3605 = vmatpush3.msra.mxu0 %v3818_v27  ;;  %v3010_v27 = vld [vmem:[#allocation9 + $0x68] sm:$0xff] }
0x1359   :  { %3620 = vmatprep.subr.mxu0 %v3956_v0 }
0x13fd   :  { %v2536_v63 = vpop.f32.mrf.mxu1 }
0x13fe   :  { %v2540_v2 = vadd.f32 %v2536_v63, %v742_v61  ;;  %v3009_v61 = vld [vmem:[#allocation9 + $0x60] sm:$0xff]  ;;  %v3008_v63 = vld [vmem:[#allocation9 + $0x58] sm:$0xff] }
0x13ff   :  { %v3575_v4 = vpop.f32.mrf.mxu1 }
0x1400   :  { %3782 = vtanh.f32 %v2540_v2  ;;  %v3148_v59 = vmul.f32 -1.442695, %v2540_v2  ;;  %v3007_v2 = vld [vmem:[#allocation9 + $0x50] sm:$0xff] }
0x1405   :  { %v2706_v6 = vpop.f32.mrf.mxu1 }
0x1407   :  { %v3597_v10 = vpop.f32.mrf.mxu1 }
0x140d   :  { %v3783_v11 = vpop.eup %3782 }
0x140e   :  { %2550 = vrot.lane.b32.xlu0 %v3783_v11, %s3958_s13  ;;  %v3005_v11 = vld [vmem:[#allocation9 + $0x40] sm:$0xff] }
0x1411   :  { %v2636_v62 = vpop.f32.mrf.mxu0 }
0x1412   :  { %v2707_v12 = vadd.f32 %v2706_v6, %v2636_v62  ;;  %v3006_v6 = vld [vmem:[#allocation9 + $0x48] sm:$0xff]  ;;  %v3004_v62 = vld [vmem:[#allocation9 + $0x38] sm:$0xff] }
0x1413   :  { %v3586_v55 = vpop.f32.mrf.mxu0 }
0x1414   :  { %v2710_v57 = vadd.f32 %v4271_v16, %v2707_v12  ;;  %v3003_v12 = vld [vmem:[#allocation9 + $0x30] sm:$0xff]  ;;  %v3002_v55 = vld [vmem:[#allocation9 + $0x28] sm:$0xff] }
0x1416   :  { %3784 = vtanh.f32 %v2710_v57  ;;  %v3151_v7 = vmul.f32 -1.442695, %v2710_v57  ;;  %v3001_v57 = vld [vmem:[#allocation9 + $0x20] sm:$0xff] }
0x1417   :  { %3786 = vpow2.f32 %v3148_v59 }
0x1423   :  { %v3785_v58 = vpop.eup %3784 }
0x1424   :  { %2720 = vrot.lane.b32.xlu1 %v3785_v58, %s3958_s13  ;;  %v3787_v3 = vpop.eup %3786  ;;  %v3000_v58 = vld [vmem:[#allocation9 + $0x18] sm:$0xff] }
0x1425   :  { %v2544_v5 = vadd.f32 1.0, %v3787_v3  ;;  %v2999_v3 = vld [vmem:[#allocation9 + $0x10] sm:$0xff] }
0x1427   :  { %3788 = vrcp.f32 %v2544_v5  ;;  %v2998_v5 = vld [vmem:[#allocation9 + $0x8] sm:$0xff] }
0x1428   :  { %3790 = vpow2.f32 %v3151_v7  ;;  %v2997_v7 = vld [vmem:[#allocation9] sm:$0xff] }
0x1434   :  { %v3789_v8 = vpop.eup %3788 }
0x1435   :  { %v3791_v14 = vpop.eup %3790  ;;  %v2548_v25 = vmul.f32 %v3789_v8, %v4539_v42  ;;  %v3819_v42 = vld [vmem:[%s4637_s6] ss:$0 sm:$0xff] }
0x1436   :  { %v2714_v15 = vadd.f32 1.0, %v3791_v14 }
0x1438   :  { %3792 = vrcp.f32 %v2714_v15 }
0x1445   :  { %v3793_v16 = vpop.eup %3792 }
0x1446   :  { %v2718_v23 = vmul.f32 %v3793_v16, %v4544_v44 }
0x1480   :  { %v2551_v9 = vpop.permute.xlu0 %2550 }
0x1481   :  { %v2553_v13 = vmul.f32 %v3789_v8, %v2551_v9 }
0x1483   :  { %2555 = vrot.lane.b32.xlu0 %v2553_v13, %s3959_s14 }
0x1496   :  { %v2721_v21 = vpop.permute.xlu1 %2720 }
0x1497   :  { %v2723_v22 = vmul.f32 %v3793_v16, %v2721_v21 }
0x1499   :  { %2725 = vrot.lane.b32.xlu1 %v2723_v22, %s3959_s14 }
0x14f5   :  { %v2556_v24 = vpop.permute.xlu0 %2555 }
0x14f6   :  { %v2558_v26 = vadd.f32 %v2556_v24, %v2548_v25 }
0x14f8   :  { %3794 = vtanh.f32 %v2558_v26 }
0x1505   :  { %v3795_v28 = vpop.eup %3794 }
0x1506   :  { %2561 = vrot.lane.b32.xlu0 %v3795_v28, %s3958_s13 }
0x150b   :  { %v2726_v30 = vpop.permute.xlu1 %2725 }
0x150c   :  { %v2728_v29 = vadd.f32 %v2726_v30, %v2718_v23 }
0x150e   :  { %3796 = vtanh.f32 %v2728_v29 }
0x151b   :  { %v3797_v32 = vpop.eup %3796 }
0x151c   :  { %2731 = vrot.lane.b32.xlu1 %v3797_v32, %s3958_s13 }
0x1578   :  { %v2562_v33 = vpop.permute.xlu0 %2561 }
0x1579   :  { %v2564_v34 = vmul.f32 %v3789_v8, %v2562_v33  ;;  %v3155_v8 = vld [vmem:[#allocation7] ss:$0 sm:$0xff] }
0x157b   :  { %2811 = vrot.lane.b32.xlu1 %v2564_v34, %s3959_s14 }
0x158e   :  { %v2732_v35 = vpop.permute.xlu1 %2731 }
0x158f   :  { %v2734_v17 = vmul.f32 %v3793_v16, %v2732_v35  ;;  %v3157_v16 = vld [vmem:[#allocation10] ss:$0 sm:$0xff] }
0x1591   :  { %2736 = vrot.lane.b32.xlu0 %v2734_v17, %s3959_s14 }
0x15ed   :  { %v2812_v36 = vpop.permute.xlu1 %2811 }
0x15ee   :  { %3618 = vmatmul.mubr.msk.f32.vlgmr.msra.gmra.mxu1 %vm745_vm4, %v2812_v36 }
0x15ef   :  { %3663 = vmatprep.mubr.msk.f32.mxu1 %vm3957_vm0, %v3956_v0  ;;  %3632 = vmatpush3.msra.mxu1 %v3012_v56 }
0x15f0   :  { %3633 = vmatprep.subr.mxu1 %v3956_v0 }
0x15f1   :  { %3634 = vmatpush3.msra.mxu1 %v3011_v60 }
0x15f2   :  { %3635 = vmatprep.subr.mxu1 %v3956_v0 }
0x15f3   :  { %3636 = vmatpush3.msra.mxu1 %v3010_v27 }
0x15f4   :  { %3637 = vmatprep.subr.mxu1 %v3956_v0 }
0x15f5   :  { %3638 = vmatpush3.msra.mxu1 %v3009_v61 }
0x15f6   :  { %3639 = vmatprep.subr.mxu1 %v3956_v0 }
0x15f7   :  { %3640 = vmatpush3.msra.mxu1 %v3008_v63 }
0x15f8   :  { %3641 = vmatprep.subr.mxu1 %v3956_v0 }
0x15f9   :  { %3642 = vmatpush3.msra.mxu1 %v3007_v2 }
0x15fa   :  { %3643 = vmatprep.subr.mxu1 %v3956_v0 }
0x15fb   :  { %3644 = vmatpush3.msra.mxu1 %v3006_v6 }
0x15fc   :  { %3645 = vmatprep.subr.mxu1 %v3956_v0 }
0x15fd   :  { %3646 = vmatpush3.msra.mxu1 %v3005_v11 }
0x15fe   :  { %3647 = vmatprep.subr.mxu1 %v3956_v0 }
0x15ff   :  { %3648 = vmatpush3.msra.mxu1 %v3004_v62 }
0x1600   :  { %3649 = vmatprep.subr.mxu1 %v3956_v0 }
0x1601   :  { %3650 = vmatpush3.msra.mxu1 %v3003_v12 }
0x1602   :  { %3651 = vmatprep.subr.mxu1 %v3956_v0 }
0x1603   :  { %v2737_v37 = vpop.permute.xlu0 %2736  ;;  %3652 = vmatpush3.msra.mxu1 %v3002_v55 }
0x1604   :  { %3607 = vmatmul.mubr.msk.f32.vlgmr.msra.gmra.mxu0 %vm745_vm4, %v2737_v37  ;;  %3653 = vmatprep.subr.mxu1 %v3956_v0 }
0x1605   :  { %3628 = vmatprep.mubr.msk.f32.mxu0 %vm3957_vm0, %v3956_v0  ;;  %3621 = vmatpush3.msra.mxu0 %v2913_v51 }
0x1606   :  { %3622 = vmatprep.subr.mxu0 %v3956_v0  ;;  %3654 = vmatpush3.msra.mxu1 %v3001_v57 }
0x1607   :  { %3623 = vmatpush3.msra.mxu0 %v2912_v52  ;;  %3655 = vmatprep.subr.mxu1 %v3956_v0 }
0x1608   :  { %3624 = vmatprep.subr.mxu0 %v3956_v0  ;;  %3656 = vmatpush3.msra.mxu1 %v3000_v58 }
0x1609   :  { %3625 = vmatpush3.msra.mxu0 %v2911_v53  ;;  %3657 = vmatprep.subr.mxu1 %v3956_v0 }
0x160a   :  { %3626 = vmatprep.subr.mxu0 %v3956_v0  ;;  %3658 = vmatpush3.msra.mxu1 %v2999_v3 }
0x160b   :  { %3627 = vmatpush3.msra.mxu0 %v2910_v45  ;;  %3659 = vmatprep.subr.mxu1 %v3956_v0 }
0x160c   :  { %3660 = vmatpush3.msra.mxu1 %v2998_v5 }
0x160d   :  { %3661 = vmatprep.subr.mxu1 %v3956_v0 }
0x160e   :  { %3662 = vmatpush3.msra.mxu1 %v2997_v7 }
0x16ae   :  { %v2881_v38 = vpop.f32.mrf.mxu1 }
0x16b0   :  { %v3619_v39 = vpop.f32.mrf.mxu1 }
0x16c4   :  { %v2806_v40 = vpop.f32.mrf.mxu0 }
0x16c5   :  { %v2882_v18 = vadd.f32 %v2881_v38, %v2806_v40 }
0x16c6   :  { %v3608_v41 = vpop.f32.mrf.mxu0 }
0x16c7   :  { %v2885_v19 = vadd.f32 %v3819_v42, %v2882_v18 }
0x16c9   :  { %3798 = vtanh.f32 %v2885_v19  ;;  %v3154_v20 = vmul.f32 -1.442695, %v2885_v19 }
0x16cb   :  { %3800 = vpow2.f32 %v3154_v20 }
0x16d6   :  { %v3799_v43 = vpop.eup %3798 }
0x16d7   :  { %2895 = vrot.lane.b32.xlu0 %v3799_v43, %s3958_s13 }
0x16d8   :  { %v3801_v44 = vpop.eup %3800 }
0x16d9   :  { %v2889_v31 = vadd.f32 1.0, %v3801_v44 }
0x16db   :  { %3802 = vrcp.f32 %v2889_v31 }
0x16e8   :  { %v3803_v1 = vpop.eup %3802 }
0x16e9   :  { %v2893_v48 = vmul.f32 %v3803_v1, %v2728_v29 }
0x1749   :  { %v2896_v47 = vpop.permute.xlu0 %2895 }
0x174a   :  { %v2898_v46 = vmul.f32 %v3803_v1, %v2896_v47 }
0x174c   :  { %2900 = vrot.lane.b32.xlu1 %v2898_v46, %s3959_s14 }
0x17be   :  { %v2901_v50 = vpop.permute.xlu1 %2900 }
0x17bf   :  { %v2903_v49 = vadd.f32 %v2901_v50, %v2893_v48 }
0x17c1   :  { %3804 = vtanh.f32 %v2903_v49 }
0x17ce   :  { %v3805_v54 = vpop.eup %3804 }
0x17cf   :  { %2906 = vrot.lane.b32.xlu0 %v3805_v54, %s3958_s13 }
0x1841   :  { %v2907_v4 = vpop.permute.xlu0 %2906 }
0x1842   :  { %v2909_v10 = vmul.f32 %v3803_v1, %v2907_v4 }
0x1844   :  { %2922 = vrot.lane.b32.xlu1 %v2909_v10, %s3959_s14 }
0x18b6   :  { %v2923_v59 = vpop.permute.xlu1 %2922 }
0x18b7   :  { %3629 = vmatmul.mubr.msk.f32.vlgmr.msra.gmra.mxu0 %vm745_vm4, %v2923_v59 }
0x1977   :  { %v2992_v9 = vpop.f32.mrf.mxu0 }
0x1978   :  { %v2993_v13 = vadd.f32 %v3155_v8, %v2992_v9 }
0x1979   :  { %v3630_v14 = vpop.f32.mrf.mxu0 }
0x197a   :  { %v2996_v15 = vmax.f32 %v2993_v13, 0.0 }
0x197c   :  { %3664 = vmatmul.mubr.f32.vlgmr.msra.gmra.mxu1 %v2996_v15 }
0x1a3c   :  { %v3086_v21 = vpop.f32.mrf.mxu1 }
0x1a3d   :  { %v3087_v22 = vadd.f32 %v3157_v16, %v3086_v21 }
0x1a3e   :  { %v3665_v25 = vpop.f32.mrf.mxu1 }
0x1a3f   :  { %3090 = vst [vmem:[%s4642_s11] sm:$0x3] %v3087_v22 }
0x1a40   :  { %3095 = vsyncpa [#allocation3], 1 }
0x1a41   :  { %3096 = vsyncpa [#allocation5], 1 }
0x1a42   :  { %3097 = vsyncpa [#allocation8], 1 }
0x1a43   :  { %3098 = vsyncpa [#allocation11], 1 }

</bundles_post_ra>
